<compile_context>
chip_gen: v7x
topology: tpu7x:2x2x1
jax: 0.10.0
libtpu: 0.0.40
codegen_flags: <defaults>
</compile_context>

<pallas_src>
import functools
import math

import jax
import jax.numpy as jnp
from jax import lax
from jax.experimental import pallas as pl
from jax.experimental.pallas import tpu as pltpu

# Module constants (from the PyTorch source).
N_EMBD = 64
BLOCK_SIZE = 256   # only tril[:T, :T] is used, so any T <= BLOCK_SIZE is valid
LN_EPS = 1e-5      # torch.nn.LayerNorm default
HID_CHUNK = 256    # FF hidden-dim tile (<=256 keeps v5e comfortably spill-free)


def _layernorm(x, gamma, beta):
    """LayerNorm over the last axis, f32 math. gamma/beta: (1, C)."""
    mean = jnp.mean(x, axis=-1, keepdims=True)
    cen = x - mean
    var = jnp.mean(cen * cen, axis=-1, keepdims=True)
    inv = lax.rsqrt(var + LN_EPS)
    return cen * inv * gamma + beta


def _block_kernel(x_ref, wqkv_ref, bqkv_ref, wp_ref, bp_ref,
                  g1_ref, be1_ref, w1_ref, bf1_ref, w2_ref, bf2_ref,
                  g2_ref, be2_ref, out_ref, ctx_sc, *,
                  n_heads, head_size, seq_len, hid_chunk):
    """One grid step = one batch-row tile (rows = Bt*T). Full Block forward."""
    H, hs, T = n_heads, head_size, seq_len
    Dh = H * hs
    rows, C = x_ref.shape
    Bt = rows // T

    x2d = x_ref[...]                              # (rows, C) f32
    x_bf = x2d.astype(jnp.bfloat16)

    # ---- fused QKV projection: one lane-dense (rows, 3*Dh) bf16 matmul, f32 accumulate ----
    qkv = jnp.dot(x_bf, wqkv_ref[...],
                  preferred_element_type=jnp.float32) + bqkv_ref[...]   # (rows, 3*Dh) f32

    # causal mask (tril): row >= col; diagonal always unmasked -> finite row max.
    r = lax.broadcasted_iota(jnp.int32, (T, T), 0)
    c = lax.broadcasted_iota(jnp.int32, (T, T), 1)
    causal = r >= c                               # (T, T) bool

    # ---- per-head attention (short static unroll); heads merged via lane-concat into scratch ----
    for h in range(H):
        q = qkv[:, h * hs:(h + 1) * hs].reshape(Bt, T, hs).astype(jnp.bfloat16)
        k = qkv[:, Dh + h * hs:Dh + (h + 1) * hs].reshape(Bt, T, hs).astype(jnp.bfloat16)
        v = qkv[:, 2 * Dh + h * hs:2 * Dh + (h + 1) * hs].reshape(Bt, T, hs).astype(jnp.bfloat16)

        # scores: (Bt, T, T); 1/sqrt(hs) is pre-folded into Wq/bq in the wrapper.
        aff = lax.dot_general(
            q, k, dimension_numbers=(((2,), (2,)), ((0,), (0,))),
            preferred_element_type=jnp.float32)
        aff = jnp.where(causal[None], aff, jnp.float32(-1e30))

        # numerically stable softmax (f32); normalization folded after P@V (T*hs muls, not T*T).
        m = jnp.max(aff, axis=-1, keepdims=True)
        p = jnp.exp(aff - m)
        denom = jnp.sum(p, axis=-1, keepdims=True)

        ctx = lax.dot_general(
            p.astype(jnp.bfloat16), v,
            dimension_numbers=(((2,), (1,)), ((0,), (0,))),
            preferred_element_type=jnp.float32)                       # (Bt, T, hs)
        ctx = ctx * pl.reciprocal(denom, approx=True)                 # EUP divide

        # lane-concat of heads via slab store into scratch (replaces K=16 per-head matmuls).
        ctx_sc[:, h * hs:(h + 1) * hs] = ctx.reshape(rows, hs).astype(jnp.bfloat16)

    # single full-depth (K = Dh) projection matmul.
    attn = jnp.dot(ctx_sc[...], wp_ref[...],
                   preferred_element_type=jnp.float32) + bp_ref[...]  # (rows, C) f32

    # ---- residual + LayerNorm 1 ----
    out1 = _layernorm(x2d + attn, g1_ref[...], be1_ref[...])
    out1_bf = out1.astype(jnp.bfloat16)

    # ---- FeedForward tiled over the 32C hidden dim: the (rows, 32C) tensor never materializes ----
    hidden = w1_ref.shape[1]
    ff = jnp.zeros((rows, C), jnp.float32)
    for j0 in range(0, hidden, hid_chunk):        # static ref slices -> zero-cost views
        hc = jnp.dot(out1_bf, w1_ref[:, j0:j0 + hid_chunk],
                     preferred_element_type=jnp.float32) + bf1_ref[:, j0:j0 + hid_chunk]
        hc = jnp.maximum(hc, 0.0).astype(jnp.bfloat16)
        ff = ff + jnp.dot(hc, w2_ref[j0:j0 + hid_chunk, :],
                          preferred_element_type=jnp.float32)
    ff = ff + bf2_ref[...]

    # ---- residual + LayerNorm 2 ----
    out2 = _layernorm(out1 + ff, g2_ref[...], be2_ref[...])
    out_ref[...] = out2.astype(out_ref.dtype)


def _pick_batch_tile(B, T, target_rows=512):
    """Cap rows = Bt*T (VMEM) and keep >=2 grid steps when possible (pipelining / v7x megacore)."""
    bt_cap = max(1, target_rows // T)
    if B >= 2:
        bt_cap = min(bt_cap, B // 2)
    bt_cap = max(1, min(bt_cap, B))
    for cand in range(bt_cap, 0, -1):
        # (rows, C) blocks need rows % 8 == 0 (or the full array) for clean sublane tiling.
        if B % cand == 0 and ((cand * T) % 8 == 0 or cand == B):
            return cand
    return B   # fallback: single step, block == full array (always legal)


def _vmem_limit_bytes(Bt, T, C, H, hs, hidden, hid_chunk):
    """Explicit scoped-VMEM limit from the per-step tile footprint (clamped to [32, 64] MiB)."""
    rows = Bt * T
    dh = H * hs
    f32, bf16 = 4, 2
    io = 2 * 2 * rows * C * f32                                   # x/out blocks, double-buffered
    weights = 2 * (C * 3 * dh * bf16 + 3 * dh * f32 + dh * C * bf16
                   + C * hidden * bf16 + hidden * C * bf16 + hidden * f32 + 6 * C * f32)
    inter = (rows * 3 * dh * (f32 + bf16)                         # qkv (f32 + bf16 views)
             + H * Bt * T * T * (f32 + bf16)                      # score maps (worst case all live)
             + rows * dh * (f32 + bf16)                           # ctx + scratch
             + rows * 5 * C * f32                                 # attn/out1/ff/out2/residual temps
             + rows * hid_chunk * (f32 + bf16))                   # FF hidden chunk
    est = io + weights + inter
    return int(min(64 << 20, max(32 << 20, 2 * est)))


def prepare_params(p, n_heads, head_size):
    """Fuse / pre-transpose / pre-scale weights for the kernel; cast MXU weights to bf16."""
    C = N_EMBD
    H, hs = n_heads, head_size
    scale = 1.0 / math.sqrt(hs)

    def stack_heads(w):  # (H, C, hs) -> (C, H*hs), head-major columns
        return jnp.transpose(w, (1, 0, 2)).reshape(C, H * hs)

    wqkv = jnp.concatenate(
        [stack_heads(p["wq"] * scale), stack_heads(p["wk"]), stack_heads(p["wv"])],
        axis=-1).astype(jnp.bfloat16)                                   # (C, 3*H*hs)
    bqkv = jnp.concatenate(
        [(p["bq"] * scale).reshape(1, H * hs),
         p["bk"].reshape(1, H * hs),
         p["bv"].reshape(1, H * hs)], axis=-1)                          # (1, 3*H*hs) f32

    return (wqkv, bqkv,
            p["wp"].astype(jnp.bfloat16), p["bp"],
            p["g1"], p["be1"],
            p["w1"].astype(jnp.bfloat16), p["bf1"],
            p["w2"].astype(jnp.bfloat16), p["bf2"],
            p["g2"], p["be2"])


def block_forward(x, params, *, n_heads, head_size, batch_tile=None):
    """x: (B, T, N_EMBD) f32. Returns (B, T, N_EMBD) f32 — forward of the PyTorch Block."""
    B, T, C = x.shape
    assert C == N_EMBD and T <= BLOCK_SIZE
    Bt = _pick_batch_tile(B, T) if batch_tile is None else batch_tile
    assert B % Bt == 0
    rows = Bt * T
    G = B // Bt
    hidden = 32 * C
    hid_chunk = HID_CHUNK if hidden % HID_CHUNK == 0 else hidden

    kp = prepare_params(params, n_heads, head_size)
    kernel = functools.partial(_block_kernel, n_heads=n_heads, head_size=head_size,
                               seq_len=T, hid_chunk=hid_chunk)

    # Weights: full-shape blocks with constant index maps (resident across grid steps, no re-DMA).
    weight_specs = [pl.BlockSpec(w.shape, lambda i, nd=w.ndim: (0,) * nd) for w in kp]

    x2d = x.reshape(B * T, C)
    out2d = pl.pallas_call(
        kernel,
        out_shape=jax.ShapeDtypeStruct((B * T, C), jnp.float32),
        grid=(G,),
        in_specs=[pl.BlockSpec((rows, C), lambda i: (i, 0))] + weight_specs,
        out_specs=pl.BlockSpec((rows, C), lambda i: (i, 0)),
        scratch_shapes=[pltpu.VMEM((rows, n_heads * head_size), jnp.bfloat16)],
        compiler_params=pltpu.CompilerParams(
            dimension_semantics=("parallel",),
            vmem_limit_bytes=_vmem_limit_bytes(Bt, T, C, n_heads, head_size, hidden, hid_chunk)),
    )(x2d, *kp)
    return out2d.reshape(B, T, C)


def init_params(key, n_heads, head_size):
    """Deterministic synthetic parameters (math layout: weights are (in, out))."""
    C = N_EMBD
    H, hs = n_heads, head_size
    hidden = 32 * C
    ks = jax.random.split(key, 16)
    s_in = 1.0 / math.sqrt(C)
    s_pr = 1.0 / math.sqrt(H * hs)
    s_h = 1.0 / math.sqrt(hidden)
    return dict(
        wq=jax.random.normal(ks[0], (H, C, hs), jnp.float32) * s_in,
        bq=jax.random.normal(ks[1], (H, 1, hs), jnp.float32) * s_in,
        wk=jax.random.normal(ks[2], (H, C, hs), jnp.float32) * s_in,
        bk=jax.random.normal(ks[3], (H, 1, hs), jnp.float32) * s_in,
        wv=jax.random.normal(ks[4], (H, C, hs), jnp.float32) * s_in,
        bv=jax.random.normal(ks[5], (H, 1, hs), jnp.float32) * s_in,
        wp=jax.random.normal(ks[6], (H * hs, C), jnp.float32) * s_pr,
        bp=jax.random.normal(ks[7], (1, C), jnp.float32) * s_pr,
        g1=1.0 + 0.1 * jax.random.normal(ks[8], (1, C), jnp.float32),
        be1=0.1 * jax.random.normal(ks[9], (1, C), jnp.float32),
        w1=jax.random.normal(ks[10], (C, hidden), jnp.float32) * s_in,
        bf1=jax.random.normal(ks[11], (1, hidden), jnp.float32) * s_in,
        w2=jax.random.normal(ks[12], (hidden, C), jnp.float32) * s_h,
        bf2=jax.random.normal(ks[13], (1, C), jnp.float32) * s_h,
        g2=1.0 + 0.1 * jax.random.normal(ks[14], (1, C), jnp.float32),
        be2=0.1 * jax.random.normal(ks[15], (1, C), jnp.float32),
    )


def _ln_ref(x, g, b):
    mean = jnp.mean(x, axis=-1, keepdims=True)
    var = jnp.mean((x - mean) ** 2, axis=-1, keepdims=True)
    return (x - mean) / jnp.sqrt(var + LN_EPS) * g + b


def reference(x, p, *, n_heads, head_size):
    """Pure-JAX f32 reference matching the PyTorch Block.forward exactly."""
    T = x.shape[1]
    tril = jnp.tril(jnp.ones((T, T), jnp.float32))
    outs = []
    for h in range(n_heads):
        q = x @ p["wq"][h] + p["bq"][h]
        k = x @ p["wk"][h] + p["bk"][h]
        v = x @ p["wv"][h] + p["bv"][h]
        aff = (q @ jnp.swapaxes(k, -1, -2)) / math.sqrt(head_size)
        aff = jnp.where(tril == 0, -jnp.inf, aff)
        aff = jax.nn.softmax(aff, axis=-1)
        outs.append(aff @ v)
    attn = jnp.concatenate(outs, axis=-1) @ p["wp"] + p["bp"]
    out1 = _ln_ref(x + attn, p["g1"], p["be1"])
    ff = jax.nn.relu(out1 @ p["w1"] + p["bf1"]) @ p["w2"] + p["bf2"]
    return _ln_ref(out1 + ff, p["g2"], p["be2"])


if __name__ == "__main__":
    B, T = 2, 8
    n_heads = 4
    head_size = N_EMBD // n_heads  # 16

    key = jax.random.PRNGKey(0)
    k_x, k_p = jax.random.split(key)
    x = jax.random.normal(k_x, (B, T, N_EMBD), jnp.float32)
    params = init_params(k_p, n_heads, head_size)

    out = block_forward(x, params, n_heads=n_heads, head_size=head_size)
    out = jax.block_until_ready(out)

    ref = reference(x, params, n_heads=n_heads, head_size=head_size)
    assert out.shape == (B, T, N_EMBD)
    # Kernel uses bf16 MXU operands (f32 accumulation) and an approx EUP reciprocal for the
    # softmax normalizer; compare to the f32 reference at bf16 tolerance.
    assert jnp.allclose(out, ref, atol=5e-2, rtol=5e-2), float(jnp.max(jnp.abs(out - ref)))

    print("KERNEL_OK")
</pallas_src>

<mosaic_0001>
module attributes {stable_mosaic.version = 11 : i64} {
  func.func @_block_kernel(%arg0: i32, %arg1: memref<8x64xf32, #tpu.memory_space<vmem>>, %arg2: memref<64x192xbf16, #tpu.memory_space<vmem>>, %arg3: memref<1x192xf32, #tpu.memory_space<vmem>>, %arg4: memref<64x64xbf16, #tpu.memory_space<vmem>>, %arg5: memref<1x64xf32, #tpu.memory_space<vmem>>, %arg6: memref<1x64xf32, #tpu.memory_space<vmem>>, %arg7: memref<1x64xf32, #tpu.memory_space<vmem>>, %arg8: memref<64x2048xbf16, #tpu.memory_space<vmem>>, %arg9: memref<1x2048xf32, #tpu.memory_space<vmem>>, %arg10: memref<2048x64xbf16, #tpu.memory_space<vmem>>, %arg11: memref<1x64xf32, #tpu.memory_space<vmem>>, %arg12: memref<1x64xf32, #tpu.memory_space<vmem>>, %arg13: memref<1x64xf32, #tpu.memory_space<vmem>>, %arg14: memref<8x64xf32, #tpu.memory_space<vmem>>, %arg15: memref<8x64xbf16, #tpu.memory_space<vmem>>) attributes {dimension_semantics = [#tpu.dimension_semantics<parallel>], iteration_bounds = array<i64: 2>, scalar_prefetch = 0 : i64, scratch_operands = 1 : i64, tpu.core_type = #tpu.core_type<tc>, window_params = [{transform_indices = @transform_0, window_bounds = array<i64: 8, 64>}, {pipeline_mode = #tpu.pipeline_mode<synchronous>, transform_indices = @transform_1, window_bounds = array<i64: 64, 192>}, {pipeline_mode = #tpu.pipeline_mode<synchronous>, transform_indices = @transform_2, window_bounds = array<i64: 1, 192>}, {pipeline_mode = #tpu.pipeline_mode<synchronous>, transform_indices = @transform_3, window_bounds = array<i64: 64, 64>}, {pipeline_mode = #tpu.pipeline_mode<synchronous>, transform_indices = @transform_4, window_bounds = array<i64: 1, 64>}, {pipeline_mode = #tpu.pipeline_mode<synchronous>, transform_indices = @transform_5, window_bounds = array<i64: 1, 64>}, {pipeline_mode = #tpu.pipeline_mode<synchronous>, transform_indices = @transform_6, window_bounds = array<i64: 1, 64>}, {pipeline_mode = #tpu.pipeline_mode<synchronous>, transform_indices = @transform_7, window_bounds = array<i64: 64, 2048>}, {pipeline_mode = #tpu.pipeline_mode<synchronous>, transform_indices = @transform_8, window_bounds = array<i64: 1, 2048>}, {pipeline_mode = #tpu.pipeline_mode<synchronous>, transform_indices = @transform_9, window_bounds = array<i64: 2048, 64>}, {pipeline_mode = #tpu.pipeline_mode<synchronous>, transform_indices = @transform_10, window_bounds = array<i64: 1, 64>}, {pipeline_mode = #tpu.pipeline_mode<synchronous>, transform_indices = @transform_11, window_bounds = array<i64: 1, 64>}, {pipeline_mode = #tpu.pipeline_mode<synchronous>, transform_indices = @transform_12, window_bounds = array<i64: 1, 64>}, {transform_indices = @transform_13, window_bounds = array<i64: 8, 64>}]} {
    %c0 = arith.constant 0 : index
    %c0_0 = arith.constant 0 : index
    %0 = vector.load %arg1[%c0, %c0_0] : memref<8x64xf32, #tpu.memory_space<vmem>>, vector<8x64xf32>
    %1 = arith.truncf %0 : vector<8x64xf32> to vector<8x64xbf16>
    %c0_1 = arith.constant 0 : index
    %c0_2 = arith.constant 0 : index
    %2 = vector.load %arg2[%c0_1, %c0_2] : memref<64x192xbf16, #tpu.memory_space<vmem>>, vector<64x192xbf16>
    %cst = arith.constant dense<0.000000e+00> : vector<8x192xf32>
    %3 = tpu.matmul %1, %2, %cst {dimension_numbers = #tpu.dot_dimension_numbers<[1], [0], [0], [1], [0, 0, 1, 1], [], []>} : vector<8x64xbf16>, vector<64x192xbf16>, vector<8x192xf32> -> vector<8x192xf32>
    %c0_3 = arith.constant 0 : index
    %c0_4 = arith.constant 0 : index
    %4 = vector.load %arg3[%c0_3, %c0_4] : memref<1x192xf32, #tpu.memory_space<vmem>>, vector<1x192xf32>
    %5 = vector.broadcast %4 : vector<1x192xf32> to vector<8x192xf32>
    %6 = arith.addf %3, %5 : vector<8x192xf32>
    %7 = tpu.iota {dimensions = array<i32: 0>} : vector<8x8xi32>
    %8 = tpu.iota {dimensions = array<i32: 1>} : vector<8x8xi32>
    %9 = arith.cmpi sge, %7, %8 : vector<8x8xi32>
    %10 = vector.extract_strided_slice %6 {offsets = [0, 0], sizes = [8, 16], strides = [1, 1]} : vector<8x192xf32> to vector<8x16xf32>
    %11 = vector.shape_cast %10 : vector<8x16xf32> to vector<1x8x16xf32>
    %12 = arith.truncf %11 : vector<1x8x16xf32> to vector<1x8x16xbf16>
    %13 = vector.extract_strided_slice %6 {offsets = [0, 64], sizes = [8, 16], strides = [1, 1]} : vector<8x192xf32> to vector<8x16xf32>
    %14 = vector.shape_cast %13 : vector<8x16xf32> to vector<1x8x16xf32>
    %15 = arith.truncf %14 : vector<1x8x16xf32> to vector<1x8x16xbf16>
    %16 = vector.extract_strided_slice %6 {offsets = [0, 128], sizes = [8, 16], strides = [1, 1]} : vector<8x192xf32> to vector<8x16xf32>
    %17 = vector.shape_cast %16 : vector<8x16xf32> to vector<1x8x16xf32>
    %18 = arith.truncf %17 : vector<1x8x16xf32> to vector<1x8x16xbf16>
    %cst_5 = arith.constant dense<0.000000e+00> : vector<1x8x8xf32>
    %19 = tpu.matmul %12, %15, %cst_5 {dimension_numbers = #tpu.dot_dimension_numbers<[2], [2], [1], [1], [0, 0, 0, 1, 1, 1], [0], [0]>} : vector<1x8x16xbf16>, vector<1x8x16xbf16>, vector<1x8x8xf32> -> vector<1x8x8xf32>
    %20 = vector.shape_cast %9 : vector<8x8xi1> to vector<1x8x8xi1>
    %cst_6 = arith.constant -1.000000e+30 : f32
    %21 = vector.broadcast %cst_6 : f32 to vector<1x8x8xf32>
    %22 = arith.select %20, %19, %21 : vector<1x8x8xi1>, vector<1x8x8xf32>
    %cst_7 = arith.constant dense<0xFF800000> : vector<1x8xf32>
    %23 = vector.multi_reduction <maximumf>, %22, %cst_7 [2] : vector<1x8x8xf32> to vector<1x8xf32>
    %24 = vector.shape_cast %23 : vector<1x8xf32> to vector<1x8x1xf32>
    %25 = vector.broadcast %24 : vector<1x8x1xf32> to vector<1x8x8xf32>
    %26 = arith.subf %22, %25 : vector<1x8x8xf32>
    %27 = math.exp %26 : vector<1x8x8xf32>
    %cst_8 = arith.constant dense<0.000000e+00> : vector<1x8xf32>
    %28 = vector.multi_reduction <add>, %27, %cst_8 [2] : vector<1x8x8xf32> to vector<1x8xf32>
    %29 = vector.shape_cast %28 : vector<1x8xf32> to vector<1x8x1xf32>
    %30 = arith.truncf %27 : vector<1x8x8xf32> to vector<1x8x8xbf16>
    %cst_9 = arith.constant dense<0.000000e+00> : vector<1x8x16xf32>
    %31 = tpu.matmul %30, %18, %cst_9 {dimension_numbers = #tpu.dot_dimension_numbers<[2], [1], [1], [2], [0, 0, 0, 1, 1, 2], [0], [0]>} : vector<1x8x8xbf16>, vector<1x8x16xbf16>, vector<1x8x16xf32> -> vector<1x8x16xf32>
    %32 = tpu.reciprocal %29 {approx = true} : vector<1x8x1xf32> -> vector<1x8x1xf32>
    %33 = vector.broadcast %32 : vector<1x8x1xf32> to vector<1x8x16xf32>
    %34 = arith.mulf %31, %33 : vector<1x8x16xf32>
    %35 = vector.shape_cast %34 : vector<1x8x16xf32> to vector<8x16xf32>
    %36 = arith.truncf %35 : vector<8x16xf32> to vector<8x16xbf16>
    %c0_10 = arith.constant 0 : index
    %c0_11 = arith.constant 0 : index
    %37 = vector.load %arg15[%c0_10, %c0_11] : memref<8x64xbf16, #tpu.memory_space<vmem>>, vector<8x16xbf16>
    tpu.vector_store %arg15[%c0_10, %c0_11], %36 {strides = array<i32>} : memref<8x64xbf16, #tpu.memory_space<vmem>>, vector<8x16xbf16>,
    %38 = vector.extract_strided_slice %6 {offsets = [0, 16], sizes = [8, 16], strides = [1, 1]} : vector<8x192xf32> to vector<8x16xf32>
    %39 = vector.shape_cast %38 : vector<8x16xf32> to vector<1x8x16xf32>
    %40 = arith.truncf %39 : vector<1x8x16xf32> to vector<1x8x16xbf16>
    %41 = vector.extract_strided_slice %6 {offsets = [0, 80], sizes = [8, 16], strides = [1, 1]} : vector<8x192xf32> to vector<8x16xf32>
    %42 = vector.shape_cast %41 : vector<8x16xf32> to vector<1x8x16xf32>
    %43 = arith.truncf %42 : vector<1x8x16xf32> to vector<1x8x16xbf16>
    %44 = vector.extract_strided_slice %6 {offsets = [0, 144], sizes = [8, 16], strides = [1, 1]} : vector<8x192xf32> to vector<8x16xf32>
    %45 = vector.shape_cast %44 : vector<8x16xf32> to vector<1x8x16xf32>
    %46 = arith.truncf %45 : vector<1x8x16xf32> to vector<1x8x16xbf16>
    %cst_12 = arith.constant dense<0.000000e+00> : vector<1x8x8xf32>
    %47 = tpu.matmul %40, %43, %cst_12 {dimension_numbers = #tpu.dot_dimension_numbers<[2], [2], [1], [1], [0, 0, 0, 1, 1, 1], [0], [0]>} : vector<1x8x16xbf16>, vector<1x8x16xbf16>, vector<1x8x8xf32> -> vector<1x8x8xf32>
    %48 = vector.shape_cast %9 : vector<8x8xi1> to vector<1x8x8xi1>
    %cst_13 = arith.constant -1.000000e+30 : f32
    %49 = vector.broadcast %cst_13 : f32 to vector<1x8x8xf32>
    %50 = arith.select %48, %47, %49 : vector<1x8x8xi1>, vector<1x8x8xf32>
    %cst_14 = arith.constant dense<0xFF800000> : vector<1x8xf32>
    %51 = vector.multi_reduction <maximumf>, %50, %cst_14 [2] : vector<1x8x8xf32> to vector<1x8xf32>
    %52 = vector.shape_cast %51 : vector<1x8xf32> to vector<1x8x1xf32>
    %53 = vector.broadcast %52 : vector<1x8x1xf32> to vector<1x8x8xf32>
    %54 = arith.subf %50, %53 : vector<1x8x8xf32>
    %55 = math.exp %54 : vector<1x8x8xf32>
    %cst_15 = arith.constant dense<0.000000e+00> : vector<1x8xf32>
    %56 = vector.multi_reduction <add>, %55, %cst_15 [2] : vector<1x8x8xf32> to vector<1x8xf32>
    %57 = vector.shape_cast %56 : vector<1x8xf32> to vector<1x8x1xf32>
    %58 = arith.truncf %55 : vector<1x8x8xf32> to vector<1x8x8xbf16>
    %cst_16 = arith.constant dense<0.000000e+00> : vector<1x8x16xf32>
    %59 = tpu.matmul %58, %46, %cst_16 {dimension_numbers = #tpu.dot_dimension_numbers<[2], [1], [1], [2], [0, 0, 0, 1, 1, 2], [0], [0]>} : vector<1x8x8xbf16>, vector<1x8x16xbf16>, vector<1x8x16xf32> -> vector<1x8x16xf32>
    %60 = tpu.reciprocal %57 {approx = true} : vector<1x8x1xf32> -> vector<1x8x1xf32>
    %61 = vector.broadcast %60 : vector<1x8x1xf32> to vector<1x8x16xf32>
    %62 = arith.mulf %59, %61 : vector<1x8x16xf32>
    %63 = vector.shape_cast %62 : vector<1x8x16xf32> to vector<8x16xf32>
    %64 = arith.truncf %63 : vector<8x16xf32> to vector<8x16xbf16>
    %c0_17 = arith.constant 0 : index
    %c16 = arith.constant 16 : index
    %65 = vector.load %arg15[%c0_17, %c16] : memref<8x64xbf16, #tpu.memory_space<vmem>>, vector<8x16xbf16>
    tpu.vector_store %arg15[%c0_17, %c16], %64 {strides = array<i32>} : memref<8x64xbf16, #tpu.memory_space<vmem>>, vector<8x16xbf16>,
    %66 = vector.extract_strided_slice %6 {offsets = [0, 32], sizes = [8, 16], strides = [1, 1]} : vector<8x192xf32> to vector<8x16xf32>
    %67 = vector.shape_cast %66 : vector<8x16xf32> to vector<1x8x16xf32>
    %68 = arith.truncf %67 : vector<1x8x16xf32> to vector<1x8x16xbf16>
    %69 = vector.extract_strided_slice %6 {offsets = [0, 96], sizes = [8, 16], strides = [1, 1]} : vector<8x192xf32> to vector<8x16xf32>
    %70 = vector.shape_cast %69 : vector<8x16xf32> to vector<1x8x16xf32>
    %71 = arith.truncf %70 : vector<1x8x16xf32> to vector<1x8x16xbf16>
    %72 = vector.extract_strided_slice %6 {offsets = [0, 160], sizes = [8, 16], strides = [1, 1]} : vector<8x192xf32> to vector<8x16xf32>
    %73 = vector.shape_cast %72 : vector<8x16xf32> to vector<1x8x16xf32>
    %74 = arith.truncf %73 : vector<1x8x16xf32> to vector<1x8x16xbf16>
    %cst_18 = arith.constant dense<0.000000e+00> : vector<1x8x8xf32>
    %75 = tpu.matmul %68, %71, %cst_18 {dimension_numbers = #tpu.dot_dimension_numbers<[2], [2], [1], [1], [0, 0, 0, 1, 1, 1], [0], [0]>} : vector<1x8x16xbf16>, vector<1x8x16xbf16>, vector<1x8x8xf32> -> vector<1x8x8xf32>
    %76 = vector.shape_cast %9 : vector<8x8xi1> to vector<1x8x8xi1>
    %cst_19 = arith.constant -1.000000e+30 : f32
    %77 = vector.broadcast %cst_19 : f32 to vector<1x8x8xf32>
    %78 = arith.select %76, %75, %77 : vector<1x8x8xi1>, vector<1x8x8xf32>
    %cst_20 = arith.constant dense<0xFF800000> : vector<1x8xf32>
    %79 = vector.multi_reduction <maximumf>, %78, %cst_20 [2] : vector<1x8x8xf32> to vector<1x8xf32>
    %80 = vector.shape_cast %79 : vector<1x8xf32> to vector<1x8x1xf32>
    %81 = vector.broadcast %80 : vector<1x8x1xf32> to vector<1x8x8xf32>
    %82 = arith.subf %78, %81 : vector<1x8x8xf32>
    %83 = math.exp %82 : vector<1x8x8xf32>
    %cst_21 = arith.constant dense<0.000000e+00> : vector<1x8xf32>
    %84 = vector.multi_reduction <add>, %83, %cst_21 [2] : vector<1x8x8xf32> to vector<1x8xf32>
    %85 = vector.shape_cast %84 : vector<1x8xf32> to vector<1x8x1xf32>
    %86 = arith.truncf %83 : vector<1x8x8xf32> to vector<1x8x8xbf16>
    %cst_22 = arith.constant dense<0.000000e+00> : vector<1x8x16xf32>
    %87 = tpu.matmul %86, %74, %cst_22 {dimension_numbers = #tpu.dot_dimension_numbers<[2], [1], [1], [2], [0, 0, 0, 1, 1, 2], [0], [0]>} : vector<1x8x8xbf16>, vector<1x8x16xbf16>, vector<1x8x16xf32> -> vector<1x8x16xf32>
    %88 = tpu.reciprocal %85 {approx = true} : vector<1x8x1xf32> -> vector<1x8x1xf32>
    %89 = vector.broadcast %88 : vector<1x8x1xf32> to vector<1x8x16xf32>
    %90 = arith.mulf %87, %89 : vector<1x8x16xf32>
    %91 = vector.shape_cast %90 : vector<1x8x16xf32> to vector<8x16xf32>
    %92 = arith.truncf %91 : vector<8x16xf32> to vector<8x16xbf16>
    %c0_23 = arith.constant 0 : index
    %c32 = arith.constant 32 : index
    %93 = vector.load %arg15[%c0_23, %c32] : memref<8x64xbf16, #tpu.memory_space<vmem>>, vector<8x16xbf16>
    tpu.vector_store %arg15[%c0_23, %c32], %92 {strides = array<i32>} : memref<8x64xbf16, #tpu.memory_space<vmem>>, vector<8x16xbf16>,
    %94 = vector.extract_strided_slice %6 {offsets = [0, 48], sizes = [8, 16], strides = [1, 1]} : vector<8x192xf32> to vector<8x16xf32>
    %95 = vector.shape_cast %94 : vector<8x16xf32> to vector<1x8x16xf32>
    %96 = arith.truncf %95 : vector<1x8x16xf32> to vector<1x8x16xbf16>
    %97 = vector.extract_strided_slice %6 {offsets = [0, 112], sizes = [8, 16], strides = [1, 1]} : vector<8x192xf32> to vector<8x16xf32>
    %98 = vector.shape_cast %97 : vector<8x16xf32> to vector<1x8x16xf32>
    %99 = arith.truncf %98 : vector<1x8x16xf32> to vector<1x8x16xbf16>
    %100 = vector.extract_strided_slice %6 {offsets = [0, 176], sizes = [8, 16], strides = [1, 1]} : vector<8x192xf32> to vector<8x16xf32>
    %101 = vector.shape_cast %100 : vector<8x16xf32> to vector<1x8x16xf32>
    %102 = arith.truncf %101 : vector<1x8x16xf32> to vector<1x8x16xbf16>
    %cst_24 = arith.constant dense<0.000000e+00> : vector<1x8x8xf32>
    %103 = tpu.matmul %96, %99, %cst_24 {dimension_numbers = #tpu.dot_dimension_numbers<[2], [2], [1], [1], [0, 0, 0, 1, 1, 1], [0], [0]>} : vector<1x8x16xbf16>, vector<1x8x16xbf16>, vector<1x8x8xf32> -> vector<1x8x8xf32>
    %104 = vector.shape_cast %9 : vector<8x8xi1> to vector<1x8x8xi1>
    %cst_25 = arith.constant -1.000000e+30 : f32
    %105 = vector.broadcast %cst_25 : f32 to vector<1x8x8xf32>
    %106 = arith.select %104, %103, %105 : vector<1x8x8xi1>, vector<1x8x8xf32>
    %cst_26 = arith.constant dense<0xFF800000> : vector<1x8xf32>
    %107 = vector.multi_reduction <maximumf>, %106, %cst_26 [2] : vector<1x8x8xf32> to vector<1x8xf32>
    %108 = vector.shape_cast %107 : vector<1x8xf32> to vector<1x8x1xf32>
    %109 = vector.broadcast %108 : vector<1x8x1xf32> to vector<1x8x8xf32>
    %110 = arith.subf %106, %109 : vector<1x8x8xf32>
    %111 = math.exp %110 : vector<1x8x8xf32>
    %cst_27 = arith.constant dense<0.000000e+00> : vector<1x8xf32>
    %112 = vector.multi_reduction <add>, %111, %cst_27 [2] : vector<1x8x8xf32> to vector<1x8xf32>
    %113 = vector.shape_cast %112 : vector<1x8xf32> to vector<1x8x1xf32>
    %114 = arith.truncf %111 : vector<1x8x8xf32> to vector<1x8x8xbf16>
    %cst_28 = arith.constant dense<0.000000e+00> : vector<1x8x16xf32>
    %115 = tpu.matmul %114, %102, %cst_28 {dimension_numbers = #tpu.dot_dimension_numbers<[2], [1], [1], [2], [0, 0, 0, 1, 1, 2], [0], [0]>} : vector<1x8x8xbf16>, vector<1x8x16xbf16>, vector<1x8x16xf32> -> vector<1x8x16xf32>
    %116 = tpu.reciprocal %113 {approx = true} : vector<1x8x1xf32> -> vector<1x8x1xf32>
    %117 = vector.broadcast %116 : vector<1x8x1xf32> to vector<1x8x16xf32>
    %118 = arith.mulf %115, %117 : vector<1x8x16xf32>
    %119 = vector.shape_cast %118 : vector<1x8x16xf32> to vector<8x16xf32>
    %120 = arith.truncf %119 : vector<8x16xf32> to vector<8x16xbf16>
    %c0_29 = arith.constant 0 : index
    %c48 = arith.constant 48 : index
    %121 = vector.load %arg15[%c0_29, %c48] : memref<8x64xbf16, #tpu.memory_space<vmem>>, vector<8x16xbf16>
    tpu.vector_store %arg15[%c0_29, %c48], %120 {strides = array<i32>} : memref<8x64xbf16, #tpu.memory_space<vmem>>, vector<8x16xbf16>,
    %c0_30 = arith.constant 0 : index
    %c0_31 = arith.constant 0 : index
    %122 = vector.load %arg15[%c0_30, %c0_31] : memref<8x64xbf16, #tpu.memory_space<vmem>>, vector<8x64xbf16>
    %c0_32 = arith.constant 0 : index
    %c0_33 = arith.constant 0 : index
    %123 = vector.load %arg4[%c0_32, %c0_33] : memref<64x64xbf16, #tpu.memory_space<vmem>>, vector<64x64xbf16>
    %cst_34 = arith.constant dense<0.000000e+00> : vector<8x64xf32>
    %124 = tpu.matmul %122, %123, %cst_34 {dimension_numbers = #tpu.dot_dimension_numbers<[1], [0], [0], [1], [0, 0, 1, 1], [], []>} : vector<8x64xbf16>, vector<64x64xbf16>, vector<8x64xf32> -> vector<8x64xf32>
    %c0_35 = arith.constant 0 : index
    %c0_36 = arith.constant 0 : index
    %125 = vector.load %arg5[%c0_35, %c0_36] : memref<1x64xf32, #tpu.memory_space<vmem>>, vector<1x64xf32>
    %126 = vector.broadcast %125 : vector<1x64xf32> to vector<8x64xf32>
    %127 = arith.addf %124, %126 : vector<8x64xf32>
    %128 = arith.addf %0, %127 : vector<8x64xf32>
    %c0_37 = arith.constant 0 : index
    %c0_38 = arith.constant 0 : index
    %129 = vector.load %arg6[%c0_37, %c0_38] : memref<1x64xf32, #tpu.memory_space<vmem>>, vector<1x64xf32>
    %c0_39 = arith.constant 0 : index
    %c0_40 = arith.constant 0 : index
    %130 = vector.load %arg7[%c0_39, %c0_40] : memref<1x64xf32, #tpu.memory_space<vmem>>, vector<1x64xf32>
    %cst_41 = arith.constant dense<0.000000e+00> : vector<8xf32>
    %131 = vector.multi_reduction <add>, %128, %cst_41 [1] : vector<8x64xf32> to vector<8xf32>
    %132 = vector.shape_cast %131 : vector<8xf32> to vector<8x1xf32>
    %cst_42 = arith.constant 6.400000e+01 : f32
    %133 = vector.broadcast %cst_42 : f32 to vector<8x1xf32>
    %134 = arith.divf %132, %133 : vector<8x1xf32>
    %135 = vector.broadcast %134 : vector<8x1xf32> to vector<8x64xf32>
    %136 = arith.subf %128, %135 : vector<8x64xf32>
    %137 = arith.mulf %136, %136 : vector<8x64xf32>
    %cst_43 = arith.constant dense<0.000000e+00> : vector<8xf32>
    %138 = vector.multi_reduction <add>, %137, %cst_43 [1] : vector<8x64xf32> to vector<8xf32>
    %139 = vector.shape_cast %138 : vector<8xf32> to vector<8x1xf32>
    %cst_44 = arith.constant 6.400000e+01 : f32
    %140 = vector.broadcast %cst_44 : f32 to vector<8x1xf32>
    %141 = arith.divf %139, %140 : vector<8x1xf32>
    %cst_45 = arith.constant 9.99999974E-6 : f32
    %142 = vector.broadcast %cst_45 : f32 to vector<8x1xf32>
    %143 = arith.addf %141, %142 : vector<8x1xf32>
    %144 = math.rsqrt %143 : vector<8x1xf32>
    %145 = vector.broadcast %144 : vector<8x1xf32> to vector<8x64xf32>
    %146 = arith.mulf %136, %145 : vector<8x64xf32>
    %147 = vector.broadcast %129 : vector<1x64xf32> to vector<8x64xf32>
    %148 = arith.mulf %146, %147 : vector<8x64xf32>
    %149 = vector.broadcast %130 : vector<1x64xf32> to vector<8x64xf32>
    %150 = arith.addf %148, %149 : vector<8x64xf32>
    %151 = arith.truncf %150 : vector<8x64xf32> to vector<8x64xbf16>
    %cst_46 = arith.constant 0.000000e+00 : f32
    %152 = vector.broadcast %cst_46 : f32 to vector<8x64xf32>
    %c0_47 = arith.constant 0 : index
    %c0_48 = arith.constant 0 : index
    %153 = vector.load %arg8[%c0_47, %c0_48] : memref<64x2048xbf16, #tpu.memory_space<vmem>>, vector<64x256xbf16>
    %cst_49 = arith.constant dense<0.000000e+00> : vector<8x256xf32>
    %154 = tpu.matmul %151, %153, %cst_49 {dimension_numbers = #tpu.dot_dimension_numbers<[1], [0], [0], [1], [0, 0, 1, 1], [], []>} : vector<8x64xbf16>, vector<64x256xbf16>, vector<8x256xf32> -> vector<8x256xf32>
    %c0_50 = arith.constant 0 : index
    %c0_51 = arith.constant 0 : index
    %155 = vector.load %arg9[%c0_50, %c0_51] : memref<1x2048xf32, #tpu.memory_space<vmem>>, vector<1x256xf32>
    %156 = vector.broadcast %155 : vector<1x256xf32> to vector<8x256xf32>
    %157 = arith.addf %154, %156 : vector<8x256xf32>
    %cst_52 = arith.constant 0.000000e+00 : f32
    %158 = vector.broadcast %cst_52 : f32 to vector<8x256xf32>
    %159 = arith.maximumf %157, %158 : vector<8x256xf32>
    %160 = arith.truncf %159 : vector<8x256xf32> to vector<8x256xbf16>
    %c0_53 = arith.constant 0 : index
    %c0_54 = arith.constant 0 : index
    %161 = vector.load %arg10[%c0_53, %c0_54] : memref<2048x64xbf16, #tpu.memory_space<vmem>>, vector<256x64xbf16>
    %cst_55 = arith.constant dense<0.000000e+00> : vector<8x64xf32>
    %162 = tpu.matmul %160, %161, %cst_55 {dimension_numbers = #tpu.dot_dimension_numbers<[1], [0], [0], [1], [0, 0, 1, 1], [], []>} : vector<8x256xbf16>, vector<256x64xbf16>, vector<8x64xf32> -> vector<8x64xf32>
    %163 = arith.addf %152, %162 : vector<8x64xf32>
    %c0_56 = arith.constant 0 : index
    %c256 = arith.constant 256 : index
    %164 = vector.load %arg8[%c0_56, %c256] : memref<64x2048xbf16, #tpu.memory_space<vmem>>, vector<64x256xbf16>
    %cst_57 = arith.constant dense<0.000000e+00> : vector<8x256xf32>
    %165 = tpu.matmul %151, %164, %cst_57 {dimension_numbers = #tpu.dot_dimension_numbers<[1], [0], [0], [1], [0, 0, 1, 1], [], []>} : vector<8x64xbf16>, vector<64x256xbf16>, vector<8x256xf32> -> vector<8x256xf32>
    %c0_58 = arith.constant 0 : index
    %c256_59 = arith.constant 256 : index
    %166 = vector.load %arg9[%c0_58, %c256_59] : memref<1x2048xf32, #tpu.memory_space<vmem>>, vector<1x256xf32>
    %167 = vector.broadcast %166 : vector<1x256xf32> to vector<8x256xf32>
    %168 = arith.addf %165, %167 : vector<8x256xf32>
    %cst_60 = arith.constant 0.000000e+00 : f32
    %169 = vector.broadcast %cst_60 : f32 to vector<8x256xf32>
    %170 = arith.maximumf %168, %169 : vector<8x256xf32>
    %171 = arith.truncf %170 : vector<8x256xf32> to vector<8x256xbf16>
    %c256_61 = arith.constant 256 : index
    %c0_62 = arith.constant 0 : index
    %172 = vector.load %arg10[%c256_61, %c0_62] : memref<2048x64xbf16, #tpu.memory_space<vmem>>, vector<256x64xbf16>
    %cst_63 = arith.constant dense<0.000000e+00> : vector<8x64xf32>
    %173 = tpu.matmul %171, %172, %cst_63 {dimension_numbers = #tpu.dot_dimension_numbers<[1], [0], [0], [1], [0, 0, 1, 1], [], []>} : vector<8x256xbf16>, vector<256x64xbf16>, vector<8x64xf32> -> vector<8x64xf32>
    %174 = arith.addf %163, %173 : vector<8x64xf32>
    %c0_64 = arith.constant 0 : index
    %c512 = arith.constant 512 : index
    %175 = vector.load %arg8[%c0_64, %c512] : memref<64x2048xbf16, #tpu.memory_space<vmem>>, vector<64x256xbf16>
    %cst_65 = arith.constant dense<0.000000e+00> : vector<8x256xf32>
    %176 = tpu.matmul %151, %175, %cst_65 {dimension_numbers = #tpu.dot_dimension_numbers<[1], [0], [0], [1], [0, 0, 1, 1], [], []>} : vector<8x64xbf16>, vector<64x256xbf16>, vector<8x256xf32> -> vector<8x256xf32>
    %c0_66 = arith.constant 0 : index
    %c512_67 = arith.constant 512 : index
    %177 = vector.load %arg9[%c0_66, %c512_67] : memref<1x2048xf32, #tpu.memory_space<vmem>>, vector<1x256xf32>
    %178 = vector.broadcast %177 : vector<1x256xf32> to vector<8x256xf32>
    %179 = arith.addf %176, %178 : vector<8x256xf32>
    %cst_68 = arith.constant 0.000000e+00 : f32
    %180 = vector.broadcast %cst_68 : f32 to vector<8x256xf32>
    %181 = arith.maximumf %179, %180 : vector<8x256xf32>
    %182 = arith.truncf %181 : vector<8x256xf32> to vector<8x256xbf16>
    %c512_69 = arith.constant 512 : index
    %c0_70 = arith.constant 0 : index
    %183 = vector.load %arg10[%c512_69, %c0_70] : memref<2048x64xbf16, #tpu.memory_space<vmem>>, vector<256x64xbf16>
    %cst_71 = arith.constant dense<0.000000e+00> : vector<8x64xf32>
    %184 = tpu.matmul %182, %183, %cst_71 {dimension_numbers = #tpu.dot_dimension_numbers<[1], [0], [0], [1], [0, 0, 1, 1], [], []>} : vector<8x256xbf16>, vector<256x64xbf16>, vector<8x64xf32> -> vector<8x64xf32>
    %185 = arith.addf %174, %184 : vector<8x64xf32>
    %c0_72 = arith.constant 0 : index
    %c768 = arith.constant 768 : index
    %186 = vector.load %arg8[%c0_72, %c768] : memref<64x2048xbf16, #tpu.memory_space<vmem>>, vector<64x256xbf16>
    %cst_73 = arith.constant dense<0.000000e+00> : vector<8x256xf32>
    %187 = tpu.matmul %151, %186, %cst_73 {dimension_numbers = #tpu.dot_dimension_numbers<[1], [0], [0], [1], [0, 0, 1, 1], [], []>} : vector<8x64xbf16>, vector<64x256xbf16>, vector<8x256xf32> -> vector<8x256xf32>
    %c0_74 = arith.constant 0 : index
    %c768_75 = arith.constant 768 : index
    %188 = vector.load %arg9[%c0_74, %c768_75] : memref<1x2048xf32, #tpu.memory_space<vmem>>, vector<1x256xf32>
    %189 = vector.broadcast %188 : vector<1x256xf32> to vector<8x256xf32>
    %190 = arith.addf %187, %189 : vector<8x256xf32>
    %cst_76 = arith.constant 0.000000e+00 : f32
    %191 = vector.broadcast %cst_76 : f32 to vector<8x256xf32>
    %192 = arith.maximumf %190, %191 : vector<8x256xf32>
    %193 = arith.truncf %192 : vector<8x256xf32> to vector<8x256xbf16>
    %c768_77 = arith.constant 768 : index
    %c0_78 = arith.constant 0 : index
    %194 = vector.load %arg10[%c768_77, %c0_78] : memref<2048x64xbf16, #tpu.memory_space<vmem>>, vector<256x64xbf16>
    %cst_79 = arith.constant dense<0.000000e+00> : vector<8x64xf32>
    %195 = tpu.matmul %193, %194, %cst_79 {dimension_numbers = #tpu.dot_dimension_numbers<[1], [0], [0], [1], [0, 0, 1, 1], [], []>} : vector<8x256xbf16>, vector<256x64xbf16>, vector<8x64xf32> -> vector<8x64xf32>
    %196 = arith.addf %185, %195 : vector<8x64xf32>
    %c0_80 = arith.constant 0 : index
    %c1024 = arith.constant 1024 : index
    %197 = vector.load %arg8[%c0_80, %c1024] : memref<64x2048xbf16, #tpu.memory_space<vmem>>, vector<64x256xbf16>
    %cst_81 = arith.constant dense<0.000000e+00> : vector<8x256xf32>
    %198 = tpu.matmul %151, %197, %cst_81 {dimension_numbers = #tpu.dot_dimension_numbers<[1], [0], [0], [1], [0, 0, 1, 1], [], []>} : vector<8x64xbf16>, vector<64x256xbf16>, vector<8x256xf32> -> vector<8x256xf32>
    %c0_82 = arith.constant 0 : index
    %c1024_83 = arith.constant 1024 : index
    %199 = vector.load %arg9[%c0_82, %c1024_83] : memref<1x2048xf32, #tpu.memory_space<vmem>>, vector<1x256xf32>
    %200 = vector.broadcast %199 : vector<1x256xf32> to vector<8x256xf32>
    %201 = arith.addf %198, %200 : vector<8x256xf32>
    %cst_84 = arith.constant 0.000000e+00 : f32
    %202 = vector.broadcast %cst_84 : f32 to vector<8x256xf32>
    %203 = arith.maximumf %201, %202 : vector<8x256xf32>
    %204 = arith.truncf %203 : vector<8x256xf32> to vector<8x256xbf16>
    %c1024_85 = arith.constant 1024 : index
    %c0_86 = arith.constant 0 : index
    %205 = vector.load %arg10[%c1024_85, %c0_86] : memref<2048x64xbf16, #tpu.memory_space<vmem>>, vector<256x64xbf16>
    %cst_87 = arith.constant dense<0.000000e+00> : vector<8x64xf32>
    %206 = tpu.matmul %204, %205, %cst_87 {dimension_numbers = #tpu.dot_dimension_numbers<[1], [0], [0], [1], [0, 0, 1, 1], [], []>} : vector<8x256xbf16>, vector<256x64xbf16>, vector<8x64xf32> -> vector<8x64xf32>
    %207 = arith.addf %196, %206 : vector<8x64xf32>
    %c0_88 = arith.constant 0 : index
    %c1280 = arith.constant 1280 : index
    %208 = vector.load %arg8[%c0_88, %c1280] : memref<64x2048xbf16, #tpu.memory_space<vmem>>, vector<64x256xbf16>
    %cst_89 = arith.constant dense<0.000000e+00> : vector<8x256xf32>
    %209 = tpu.matmul %151, %208, %cst_89 {dimension_numbers = #tpu.dot_dimension_numbers<[1], [0], [0], [1], [0, 0, 1, 1], [], []>} : vector<8x64xbf16>, vector<64x256xbf16>, vector<8x256xf32> -> vector<8x256xf32>
    %c0_90 = arith.constant 0 : index
    %c1280_91 = arith.constant 1280 : index
    %210 = vector.load %arg9[%c0_90, %c1280_91] : memref<1x2048xf32, #tpu.memory_space<vmem>>, vector<1x256xf32>
    %211 = vector.broadcast %210 : vector<1x256xf32> to vector<8x256xf32>
    %212 = arith.addf %209, %211 : vector<8x256xf32>
    %cst_92 = arith.constant 0.000000e+00 : f32
    %213 = vector.broadcast %cst_92 : f32 to vector<8x256xf32>
    %214 = arith.maximumf %212, %213 : vector<8x256xf32>
    %215 = arith.truncf %214 : vector<8x256xf32> to vector<8x256xbf16>
    %c1280_93 = arith.constant 1280 : index
    %c0_94 = arith.constant 0 : index
    %216 = vector.load %arg10[%c1280_93, %c0_94] : memref<2048x64xbf16, #tpu.memory_space<vmem>>, vector<256x64xbf16>
    %cst_95 = arith.constant dense<0.000000e+00> : vector<8x64xf32>
    %217 = tpu.matmul %215, %216, %cst_95 {dimension_numbers = #tpu.dot_dimension_numbers<[1], [0], [0], [1], [0, 0, 1, 1], [], []>} : vector<8x256xbf16>, vector<256x64xbf16>, vector<8x64xf32> -> vector<8x64xf32>
    %218 = arith.addf %207, %217 : vector<8x64xf32>
    %c0_96 = arith.constant 0 : index
    %c1536 = arith.constant 1536 : index
    %219 = vector.load %arg8[%c0_96, %c1536] : memref<64x2048xbf16, #tpu.memory_space<vmem>>, vector<64x256xbf16>
    %cst_97 = arith.constant dense<0.000000e+00> : vector<8x256xf32>
    %220 = tpu.matmul %151, %219, %cst_97 {dimension_numbers = #tpu.dot_dimension_numbers<[1], [0], [0], [1], [0, 0, 1, 1], [], []>} : vector<8x64xbf16>, vector<64x256xbf16>, vector<8x256xf32> -> vector<8x256xf32>
    %c0_98 = arith.constant 0 : index
    %c1536_99 = arith.constant 1536 : index
    %221 = vector.load %arg9[%c0_98, %c1536_99] : memref<1x2048xf32, #tpu.memory_space<vmem>>, vector<1x256xf32>
    %222 = vector.broadcast %221 : vector<1x256xf32> to vector<8x256xf32>
    %223 = arith.addf %220, %222 : vector<8x256xf32>
    %cst_100 = arith.constant 0.000000e+00 : f32
    %224 = vector.broadcast %cst_100 : f32 to vector<8x256xf32>
    %225 = arith.maximumf %223, %224 : vector<8x256xf32>
    %226 = arith.truncf %225 : vector<8x256xf32> to vector<8x256xbf16>
    %c1536_101 = arith.constant 1536 : index
    %c0_102 = arith.constant 0 : index
    %227 = vector.load %arg10[%c1536_101, %c0_102] : memref<2048x64xbf16, #tpu.memory_space<vmem>>, vector<256x64xbf16>
    %cst_103 = arith.constant dense<0.000000e+00> : vector<8x64xf32>
    %228 = tpu.matmul %226, %227, %cst_103 {dimension_numbers = #tpu.dot_dimension_numbers<[1], [0], [0], [1], [0, 0, 1, 1], [], []>} : vector<8x256xbf16>, vector<256x64xbf16>, vector<8x64xf32> -> vector<8x64xf32>
    %229 = arith.addf %218, %228 : vector<8x64xf32>
    %c0_104 = arith.constant 0 : index
    %c1792 = arith.constant 1792 : index
    %230 = vector.load %arg8[%c0_104, %c1792] : memref<64x2048xbf16, #tpu.memory_space<vmem>>, vector<64x256xbf16>
    %cst_105 = arith.constant dense<0.000000e+00> : vector<8x256xf32>
    %231 = tpu.matmul %151, %230, %cst_105 {dimension_numbers = #tpu.dot_dimension_numbers<[1], [0], [0], [1], [0, 0, 1, 1], [], []>} : vector<8x64xbf16>, vector<64x256xbf16>, vector<8x256xf32> -> vector<8x256xf32>
    %c0_106 = arith.constant 0 : index
    %c1792_107 = arith.constant 1792 : index
    %232 = vector.load %arg9[%c0_106, %c1792_107] : memref<1x2048xf32, #tpu.memory_space<vmem>>, vector<1x256xf32>
    %233 = vector.broadcast %232 : vector<1x256xf32> to vector<8x256xf32>
    %234 = arith.addf %231, %233 : vector<8x256xf32>
    %cst_108 = arith.constant 0.000000e+00 : f32
    %235 = vector.broadcast %cst_108 : f32 to vector<8x256xf32>
    %236 = arith.maximumf %234, %235 : vector<8x256xf32>
    %237 = arith.truncf %236 : vector<8x256xf32> to vector<8x256xbf16>
    %c1792_109 = arith.constant 1792 : index
    %c0_110 = arith.constant 0 : index
    %238 = vector.load %arg10[%c1792_109, %c0_110] : memref<2048x64xbf16, #tpu.memory_space<vmem>>, vector<256x64xbf16>
    %cst_111 = arith.constant dense<0.000000e+00> : vector<8x64xf32>
    %239 = tpu.matmul %237, %238, %cst_111 {dimension_numbers = #tpu.dot_dimension_numbers<[1], [0], [0], [1], [0, 0, 1, 1], [], []>} : vector<8x256xbf16>, vector<256x64xbf16>, vector<8x64xf32> -> vector<8x64xf32>
    %240 = arith.addf %229, %239 : vector<8x64xf32>
    %c0_112 = arith.constant 0 : index
    %c0_113 = arith.constant 0 : index
    %241 = vector.load %arg11[%c0_112, %c0_113] : memref<1x64xf32, #tpu.memory_space<vmem>>, vector<1x64xf32>
    %242 = vector.broadcast %241 : vector<1x64xf32> to vector<8x64xf32>
    %243 = arith.addf %240, %242 : vector<8x64xf32>
    %244 = arith.addf %150, %243 : vector<8x64xf32>
    %c0_114 = arith.constant 0 : index
    %c0_115 = arith.constant 0 : index
    %245 = vector.load %arg12[%c0_114, %c0_115] : memref<1x64xf32, #tpu.memory_space<vmem>>, vector<1x64xf32>
    %c0_116 = arith.constant 0 : index
    %c0_117 = arith.constant 0 : index
    %246 = vector.load %arg13[%c0_116, %c0_117] : memref<1x64xf32, #tpu.memory_space<vmem>>, vector<1x64xf32>
    %cst_118 = arith.constant dense<0.000000e+00> : vector<8xf32>
    %247 = vector.multi_reduction <add>, %244, %cst_118 [1] : vector<8x64xf32> to vector<8xf32>
    %248 = vector.shape_cast %247 : vector<8xf32> to vector<8x1xf32>
    %cst_119 = arith.constant 6.400000e+01 : f32
    %249 = vector.broadcast %cst_119 : f32 to vector<8x1xf32>
    %250 = arith.divf %248, %249 : vector<8x1xf32>
    %251 = vector.broadcast %250 : vector<8x1xf32> to vector<8x64xf32>
    %252 = arith.subf %244, %251 : vector<8x64xf32>
    %253 = arith.mulf %252, %252 : vector<8x64xf32>
    %cst_120 = arith.constant dense<0.000000e+00> : vector<8xf32>
    %254 = vector.multi_reduction <add>, %253, %cst_120 [1] : vector<8x64xf32> to vector<8xf32>
    %255 = vector.shape_cast %254 : vector<8xf32> to vector<8x1xf32>
    %cst_121 = arith.constant 6.400000e+01 : f32
    %256 = vector.broadcast %cst_121 : f32 to vector<8x1xf32>
    %257 = arith.divf %255, %256 : vector<8x1xf32>
    %cst_122 = arith.constant 9.99999974E-6 : f32
    %258 = vector.broadcast %cst_122 : f32 to vector<8x1xf32>
    %259 = arith.addf %257, %258 : vector<8x1xf32>
    %260 = math.rsqrt %259 : vector<8x1xf32>
    %261 = vector.broadcast %260 : vector<8x1xf32> to vector<8x64xf32>
    %262 = arith.mulf %252, %261 : vector<8x64xf32>
    %263 = vector.broadcast %245 : vector<1x64xf32> to vector<8x64xf32>
    %264 = arith.mulf %262, %263 : vector<8x64xf32>
    %265 = vector.broadcast %246 : vector<1x64xf32> to vector<8x64xf32>
    %266 = arith.addf %264, %265 : vector<8x64xf32>
    %c0_123 = arith.constant 0 : index
    %c0_124 = arith.constant 0 : index
    %267 = vector.load %arg14[%c0_123, %c0_124] : memref<8x64xf32, #tpu.memory_space<vmem>>, vector<8x64xf32>
    tpu.vector_store %arg14[%c0_123, %c0_124], %266 {strides = array<i32>} : memref<8x64xf32, #tpu.memory_space<vmem>>, vector<8x64xf32>,
    return
  }
  func.func @transform_0(%arg0: i32) -> (i32, i32) {
    %c0_i32 = arith.constant 0 : i32
    %c0_i32_0 = arith.constant 0 : i32
    return %arg0, %c0_i32 : i32, i32
  }
  func.func @transform_1(%arg0: i32) -> (i32, i32) {
    %c0_i32 = arith.constant 0 : i32
    %c0_i32_0 = arith.constant 0 : i32
    %c0_i32_1 = arith.constant 0 : i32
    return %c0_i32, %c0_i32_0 : i32, i32
  }
  func.func @transform_2(%arg0: i32) -> (i32, i32) {
    %c0_i32 = arith.constant 0 : i32
    %c0_i32_0 = arith.constant 0 : i32
    %c0_i32_1 = arith.constant 0 : i32
    return %c0_i32, %c0_i32_0 : i32, i32
  }
  func.func @transform_3(%arg0: i32) -> (i32, i32) {
    %c0_i32 = arith.constant 0 : i32
    %c0_i32_0 = arith.constant 0 : i32
    %c0_i32_1 = arith.constant 0 : i32
    return %c0_i32, %c0_i32_0 : i32, i32
  }
  func.func @transform_4(%arg0: i32) -> (i32, i32) {
    %c0_i32 = arith.constant 0 : i32
    %c0_i32_0 = arith.constant 0 : i32
    %c0_i32_1 = arith.constant 0 : i32
    return %c0_i32, %c0_i32_0 : i32, i32
  }
  func.func @transform_5(%arg0: i32) -> (i32, i32) {
    %c0_i32 = arith.constant 0 : i32
    %c0_i32_0 = arith.constant 0 : i32
    %c0_i32_1 = arith.constant 0 : i32
    return %c0_i32, %c0_i32_0 : i32, i32
  }
  func.func @transform_6(%arg0: i32) -> (i32, i32) {
    %c0_i32 = arith.constant 0 : i32
    %c0_i32_0 = arith.constant 0 : i32
    %c0_i32_1 = arith.constant 0 : i32
    return %c0_i32, %c0_i32_0 : i32, i32
  }
  func.func @transform_7(%arg0: i32) -> (i32, i32) {
    %c0_i32 = arith.constant 0 : i32
    %c0_i32_0 = arith.constant 0 : i32
    %c0_i32_1 = arith.constant 0 : i32
    return %c0_i32, %c0_i32_0 : i32, i32
  }
  func.func @transform_8(%arg0: i32) -> (i32, i32) {
    %c0_i32 = arith.constant 0 : i32
    %c0_i32_0 = arith.constant 0 : i32
    %c0_i32_1 = arith.constant 0 : i32
    return %c0_i32, %c0_i32_0 : i32, i32
  }
  func.func @transform_9(%arg0: i32) -> (i32, i32) {
    %c0_i32 = arith.constant 0 : i32
    %c0_i32_0 = arith.constant 0 : i32
    %c0_i32_1 = arith.constant 0 : i32
    return %c0_i32, %c0_i32_0 : i32, i32
  }
  func.func @transform_10(%arg0: i32) -> (i32, i32) {
    %c0_i32 = arith.constant 0 : i32
    %c0_i32_0 = arith.constant 0 : i32
    %c0_i32_1 = arith.constant 0 : i32
    return %c0_i32, %c0_i32_0 : i32, i32
  }
  func.func @transform_11(%arg0: i32) -> (i32, i32) {
    %c0_i32 = arith.constant 0 : i32
    %c0_i32_0 = arith.constant 0 : i32
    %c0_i32_1 = arith.constant 0 : i32
    return %c0_i32, %c0_i32_0 : i32, i32
  }
  func.func @transform_12(%arg0: i32) -> (i32, i32) {
    %c0_i32 = arith.constant 0 : i32
    %c0_i32_0 = arith.constant 0 : i32
    %c0_i32_1 = arith.constant 0 : i32
    return %c0_i32, %c0_i32_0 : i32, i32
  }
  func.func @transform_13(%arg0: i32) -> (i32, i32) {
    %c0_i32 = arith.constant 0 : i32
    %c0_i32_0 = arith.constant 0 : i32
    return %arg0, %c0_i32 : i32, i32
  }
}

</mosaic_0001>

<bundles_post_ra>
// kernel: tpu_custom_call.1
= control target key start
LH: loop header
LB: loop body
LE: loop exit
PB: predicated region body
PF: predicated region fallthrough
CT: control target
= control target key end

     0   :  { %18 = vsyncpa [#allocation4], 0  ;;  %s5243_s0 = inlined_call_operand.vmem [shape: f32[16,64], index: 0, kind: input, shape index: {}]   ;;  %s5244_s1 = inlined_call_operand.vmem [shape: bf16[64,192], index: 1, kind: input, shape index: {}]   ;;  %s5245_s2 = inlined_call_operand.vmem [shape: f32[1,192], index: 2, kind: input, shape index: {}]   ;;  %s5246_s3 = inlined_call_operand.vmem [shape: bf16[64,64], index: 3, kind: input, shape index: {}]   ;;  %s5247_s4 = inlined_call_operand.vmem [shape: f32[1,64], index: 4, kind: input, shape index: {}]   ;;  %s5248_s5 = inlined_call_operand.vmem [shape: f32[1,64], index: 5, kind: input, shape index: {}]   ;;  %s5249_s6 = inlined_call_operand.vmem [shape: f32[1,64], index: 6, kind: input, shape index: {}]   ;;  %s5250_s7 = inlined_call_operand.vmem [shape: bf16[64,2048], index: 7, kind: input, shape index: {}]   ;;  %s5251_s8 = inlined_call_operand.vmem [shape: f32[1,2048], index: 8, kind: input, shape index: {}]   ;;  %s5252_s9 = inlined_call_operand.vmem [shape: bf16[2048,64], index: 9, kind: input, shape index: {}]   ;;  %s5253_s10 = inlined_call_operand.vmem [shape: f32[1,64], index: 10, kind: input, shape index: {}]   ;;  %s5254_s11 = inlined_call_operand.vmem [shape: f32[1,64], index: 11, kind: input, shape index: {}]   ;;  %s5255_s12 = inlined_call_operand.vmem [shape: f32[1,64], index: 12, kind: input, shape index: {}]   ;;  %s5256_s13 = inlined_call_operand.hbm [shape: f32[16,64], index: 13, kind: output, shape index: {}]  }
   0x1   :  { %20 = vsyncpa [#allocation4 + $0x1], 0  ;;  %s4305_s25 = smov 0   ;;  %s4307_s26 = smov 0  }
   0x2   :  { %s4309_s27 = smov 0   ;;  %s4311_s28 = smov 0  }
   0x3 LB: > { %5262 = sst [smem:[#allocation6_spill]] %s4210_s25  ;;  %s4326_s29 = sadd.s32 4294967295, %s4222_s28   ;;  %s4222_s28 = sphi %s4311_s28, %s5271_s28   ;;  %s4218_s27 = sphi %s4309_s27, %s5273_s27   ;;  %s4214_s26 = sphi %s4307_s26, %s5275_s26   ;;  %s4210_s25 = sphi %s4305_s25, %s5274_s25  }
   0x4   : > { %5263 = sst [smem:[#allocation7_spill]] %s4218_s27  ;;  %s3446_s30 = sadd.s32 4294967294, %s4222_s28  }
   0x5   : > { %s4330_s14 = sadd.s32 1, %s4222_s28   ;;  %s311_s15 = sadd.s32 1, %s4218_s27 }
   0x6   : > { %5264 = sst [smem:[#allocation8_spill]] %s4330_s14  ;;  %s308_s16 = ssub.s32 %s4222_s28, %s4330_s14 }
   0x7   : > { %p321_p0 = scmp.ne.s32.totalorder %s4218_s27, %s4214_s26  ;;  %p309_p1 = scmp.eq.s32.totalorder %s308_s16, 0 }
   0x8   : > { %p322_p2 = scmp.eq.s32.totalorder %s4326_s29, 1  ;;  %p327_p3 = scmp.ne.s32.totalorder %s4214_s26, %s4210_s25 }
   0x9   : > { %p328_p4 = scmp.eq.s32.totalorder %s3446_s30, 1  ;;  %p3449_p7 = scmp.ge.s32.totalorder %s4222_s28, 1 }
   0xa   : > { %s4341_s17 = scalar_select %p309_p1, %s4218_s27, %s311_s15  }
   0xb   : > { %p4343_p5 = por %p322_p2, %p321_p0  ;;  %p4347_p6 = por %p328_p4, %p327_p3 }
   0xc   : > { %5265 = sst [smem:[#allocation9_spill]] %s4341_s17  ;;  %p389_p8 = scmp.lt.s32.totalorder %s4222_s28, 3 }
   0xd   : > { %s5267_s19 = scalar_select %p4347_p6, 1, 0 }
   0xe   : > { %p390_p9 = pnand %p3449_p7, %p389_p8 }
   0xf   : > { %5268 = sst [smem:[#allocation10_spill]] %s5267_s19  ;;  %v3996_v0 = vld [vmem:[%s5244_s1 + $0x4] ss:$8 sps:$4 sm:$0xff] (!%p390_p9)   ;;  %p432_p10 = scmp.lt.s32.totalorder (!%p390_p9), %s4326_s29, 1  ;;  %v3998_v1 = vld [vmem:[%s5244_s1] ss:$8 sps:$4 sm:$0xff] (!%p390_p9)   ;;  %v449_v12 = vlaneseq (!%p390_p9) }
  0x10   : > { %393 = sbr.rel (%p390_p9) target bundleno = 3159 (0xc57), region = 72  ;;  %v4224_v2 = vmov (!%p390_p9), 0   ;;  %503 = vmatprep.subr.bf16.mxu0 (!%p390_p9), %v3996_v0  ;;  %v3999_v3 = vld [vmem:[%s5244_s1 + $0x14] ss:$8 sps:$4 sm:$0xff] (!%p390_p9)   ;;  %v4001_v4 = vld [vmem:[%s5244_s1 + $0x10] ss:$8 sps:$4 sm:$0xff] (!%p390_p9)  }
  0x11   : > { %535 = vmatprep.mubr.bf16.mxu0 (!%p390_p9), %v4224_v2  ;;  %504 = vmatpush1.bf16.msra.mxu0 (!%p390_p9), %v3998_v1  ;;  %v4002_v5 = vld [vmem:[%s5244_s1 + $0x24] ss:$8 sps:$4 sm:$0xff] (!%p390_p9)   ;;  %v4004_v6 = vld [vmem:[%s5244_s1 + $0x20] ss:$8 sps:$4 sm:$0xff] (!%p390_p9)   ;;  %v4005_v7 = vld [vmem:[%s5244_s1 + $0x34] ss:$8 sps:$4 sm:$0xff] (!%p390_p9)  }
  0x12   : > { %505 = vmatprep.subr.bf16.mxu0 (!%p390_p9), %v3999_v3  ;;  %vm499_vm0 = vcmask (!%p390_p9), 523264   ;;  %v4007_v8 = vld [vmem:[%s5244_s1 + $0x30] ss:$8 sps:$4 sm:$0xff] (!%p390_p9)   ;;  %v4225_v11 = vmov (!%p390_p9), 0.0   ;;  %v4391_v13 = vshrl.u32 (!%p390_p9), %v449_v12, 7  ;;  %vm4226_vm1 = vmmov (!%p390_p9), 0  }
  0x13   : > { %3893 = vmatprep.subr.bf16.mxu1 (!%p390_p9), %v4225_v11  ;;  %v447_v15 = vld [vmem:[%s5245_s2] sm:$0x3] (!%p390_p9)  ;;  %3895 = vmatprep.mubr.msk.bf16.mxu1 (!%p390_p9), %vm4226_vm1, %v4225_v11  ;;  %vm616_vm2 = vcmask (!%p390_p9), 1043456   ;;  %s4227_s14 = smov (!%p390_p9), 112   ;;  %s4228_s17 = smov (!%p390_p9), 64   ;;  %vm554_vm3 = vcmask (!%p390_p9), 130048  }
  0x14   : > { %v4394_v14 = vsub.s32 (!%p390_p9), 0, %v4391_v13  ;;  %v4400_v16 = vsub.s32 (!%p390_p9), 1, %v4391_v13  ;;  %s4229_s19 = smov (!%p390_p9), 32   ;;  %s4231_s21 = smov (!%p390_p9), 16   ;;  %v547_v39 = vand.u32 (!%p390_p9), 127, %v449_v12  ;;  %vm602_vm5 = vcmask (!%p390_p9), 64512  }
  0x15   : > { %506 = vmatpush1.bf16.msra.mxu0 (!%p390_p9), %v4001_v4  ;;  %s4233_s23 = smov (!%p390_p9), 80   ;;  %vm663_vm6 = vcmask (!%p390_p9), 125952   ;;  %vm784_vm7 = vcmask (!%p390_p9), 257152   ;;  %vm904_vm8 = vcmask (!%p390_p9), 388352   ;;  %vm1024_vm9 = vcmask (!%p390_p9), 519552   ;;  %s429_s24 = sand.u32 (!%p390_p9), 1, %s4214_s26  }
  0x16   : > { %507 = vmatprep.subr.bf16.mxu0 (!%p390_p9), %v4002_v5  ;;  %v452_v17 = vrot.slane (!%p390_p9), %v447_v15, %v4394_v14  ;;  %v456_v18 = vrot.slane (!%p390_p9), %v447_v15, %v4400_v16  ;;  %vm548_vm4 = vcmp.ge.s32.totalorder (!%p390_p9), %v4391_v13, %v547_v39  ;;  %s3450_s30 = sshll.u32 (!%p390_p9), %s429_s24, 3 }
  0x17   : > { %s433_s15 = scalar_select %p432_p10, %s4326_s29, 1 }
  0x19   : > { %s3451_s22 = sshll.u32 %s433_s15, 3  ;;  %508 = vmatpush1.bf16.msra.mxu0 %v4004_v6  ;;  %s4230_s15 = smov 48  }
  0x1a   : > { %s435_s25 = scalar_lea.vmem %s5243_s0, %s3451_s22  ;;  %509 = vmatprep.subr.bf16.mxu0 %v4005_v7  ;;  %s4232_s22 = smov 96  }
  0x1b   : > { %v4383_v9 = vld [vmem:[%s435_s25] sm:$0xff] }
  0x1c   : > { %v438_v10 = vpack.c.bf16 %v4383_v9, %v4383_v9 }
  0x1d   : > { %510 = vmatpush1.bf16.msra.mxu0 %v4007_v8 }
  0x1e   : > { %3887 = vmatprep.subr.bf16.mxu0 %v4225_v11 }
  0x20   : > { %3460 = vmatmul.mubr.msk.bf16.vlgmr.msra.gmra.mrb[0].mxu0 %vm499_vm0, %v438_v10 }
  0x21   : > { %3889 = vmatprep.mubr.msk.bf16.mxu0 %vm4226_vm1, %v4225_v11 }
  0xf3   : > { %v537_v19 = vpop.f32.mrb[0].mxu0 }
  0xf4   : > { %v538_v20 = vadd.f32 %v537_v19, %v452_v17  ;;  %v539_v21 = vpop.f32.mrb[1].mxu0 }
  0xf5   : > { %v540_v22 = vadd.f32 %v539_v21, %v456_v18  ;;  %v541_v23 = vpop.f32.mrb[2].mxu0 }
  0xf6   : > { %v549_v24 = vpack.c.bf16 %v538_v20, %v538_v20  ;;  %v542_v25 = vpop.f32.mrb[3].mxu0 }
  0xf7   : > { %v4408_v26 = vpack.c.bf16 %v540_v22, %v540_v22 }
  0xf8   : > { %665 = vrot.lane.b32.xlu1 %v549_v24, %s4227_s14  ;;  %552 = vrot.lane.b32.xlu0 %v549_v24, %s4228_s17  ;;  %s431_s17 = scalar_lea.vmem [#allocation3], %s3450_s30 }
  0xf9   : > { %v618_v27 = vsel %vm616_vm2, %v4408_v26, 0 }
  0xfa   : > { %3894 = vmatpush3.bf16.msra.mxu1 %v618_v27 }
  0xfb   : > { %3905 = vmatprep.subr.bf16.mxu1 %v4225_v11 }
  0xfc   : > { %788 = vrot.lane.b32.xlu1 %v549_v24, %s4229_s19  ;;  %667 = vrot.lane.b32.xlu0 %v549_v24, %s4230_s15 }
 0x100   : > { %908 = vrot.lane.b32.xlu1 %v549_v24, %s4231_s21  ;;  %786 = vrot.lane.b32.xlu0 %v549_v24, %s4232_s22 }
 0x104   : > { %906 = vrot.lane.b32.xlu0 %v549_v24, %s4233_s23 }
 0x16a   : > { %v553_v28 = vpop.permute.xlu0 %552  ;;  %v666_v31 = vpop.permute.xlu1 %665 }
 0x16b   : > { %v559_v29 = vsel %vm554_vm3, %v553_v28, 0 }
 0x16c   : > { %3888 = vmatpush3.bf16.xpose.msra.mxu0 %v559_v29 }
 0x16d   : > { %3899 = vmatprep.subr.bf16.mxu0 %v4225_v11 }
 0x16e   : > { %v668_v30 = vpop.permute.xlu0 %667  ;;  %v789_v33 = vpop.permute.xlu1 %788 }
 0x16f   : > { %v673_v32 = vsel %vm554_vm3, %v668_v30, 0  ;;  %v794_v34 = vsel %vm554_vm3, %v789_v33, 0 }
 0x172   : > { %v909_v35 = vpop.permute.xlu1 %908  ;;  %v787_v36 = vpop.permute.xlu0 %786 }
 0x173   : > { %3890 = vmatmul.mubr.msk.bf16.vlgmr.msra.gmra.mrb[4].mxu0 %vm554_vm3, %v549_v24  ;;  %v914_v37 = vsel %vm554_vm3, %v909_v35, 0 }
 0x174   : > { %3900 = vmatpush3.bf16.xpose.msra.mxu0 %v673_v32  ;;  %3901 = vmatprep.mubr.msk.bf16.mxu0 %vm4226_vm1, %v4225_v11 }
 0x175   : > { %3911 = vmatprep.subr.bf16.mxu0 %v4225_v11 }
 0x176   : > { %v907_v38 = vpop.permute.xlu0 %906 }
 0x17b   : > { %3902 = vmatmul.mubr.msk.bf16.vlgmr.msra.gmra.mrb[8].mxu0 %vm554_vm3, %v666_v31 }
 0x17c   : > { %3912 = vmatpush3.bf16.xpose.msra.mxu0 %v794_v34  ;;  %3913 = vmatprep.mubr.msk.bf16.mxu0 %vm4226_vm1, %v4225_v11 }
 0x17d   : > { %3923 = vmatprep.subr.bf16.mxu0 %v4225_v11 }
 0x183   : > { %3914 = vmatmul.mubr.msk.bf16.vlgmr.msra.gmra.mrb[12].mxu0 %vm554_vm3, %v787_v36 }
 0x184   : > { %3924 = vmatpush3.bf16.xpose.msra.mxu0 %v914_v37  ;;  %3925 = vmatprep.mubr.msk.bf16.mxu0 %vm4226_vm1, %v4225_v11 }
 0x185   : > { %3935 = vmatprep.subr.bf16.mxu0 %v4225_v11 }
 0x18b   : > { %3926 = vmatmul.mubr.msk.bf16.vlgmr.msra.gmra.mrb[16].mxu0 %vm554_vm3, %v907_v38 }
 0x18c   : > { %3943 = vmatprep.mubr.msk.bf16.mxu0 %vm4226_vm1, %v4225_v11 }
 0x246   : > { %v595_v40 = vpop.f32.mrb[4].mxu0 }
 0x247   : > { %v601_v41 = vsel %vm548_vm4, %v595_v40, -1e+30  ;;  %v3891_v42 = vpop.f32.mrb[5].mxu0 }
 0x248   : > { %v598_v43 = vpop.f32.mrb[6].mxu0  ;;  %v603_v44 = vsel %vm602_vm5, %v601_v41, -inf }
 0x249   : > { %604 = vmax.xlane.f32.xlu1 %v603_v44  ;;  %v3892_v45 = vpop.f32.mrb[7].mxu0 }
 0x24e   : > { %v709_v46 = vpop.f32.mrb[8].mxu0 }
 0x24f   : > { %v715_v47 = vsel %vm548_vm4, %v709_v46, -1e+30  ;;  %v3903_v48 = vpop.f32.mrb[9].mxu0 }
 0x250   : > { %v712_v49 = vpop.f32.mrb[10].mxu0  ;;  %v716_v50 = vsel %vm602_vm5, %v715_v47, -inf  ;;  %v4008_v48 = vld [vmem:[%s5246_s3] sm:$0xff]  }
 0x251   : > { %717 = vmax.xlane.f32.xlu0 %v716_v50  ;;  %v3904_v51 = vpop.f32.mrb[11].mxu0  ;;  %3936 = vmatpush3.bf16.msra.mxu0 %v4008_v48 }
 0x252   : > { %3937 = vmatprep.subr.bf16.mxu0 %v4225_v11 }
 0x256   : > { %v830_v52 = vpop.f32.mrb[12].mxu0 }
 0x257   : > { %v836_v53 = vsel %vm548_vm4, %v830_v52, -1e+30  ;;  %v3915_v54 = vpop.f32.mrb[13].mxu0  ;;  %v4009_v52 = vld [vmem:[%s5246_s3 + $0x8] sm:$0xff]  }
 0x258   : > { %v833_v55 = vpop.f32.mrb[14].mxu0  ;;  %v837_v56 = vsel %vm602_vm5, %v836_v53, -inf  ;;  %3938 = vmatpush3.bf16.msra.mxu0 %v4009_v52  ;;  %v1148_v52 = vld [vmem:[%s5250_s7 + $0x1c0] sm:$0xff] }
 0x259   : > { %838 = vmax.xlane.f32.xlu0 %v837_v56  ;;  %v3916_v57 = vpop.f32.mrb[15].mxu0  ;;  %3939 = vmatprep.subr.bf16.mxu0 %v4225_v11 }
 0x25a   : > { %847 = vrot.lane.b32.xlu1 %v4408_v26, %s4232_s22 }
 0x25e   : > { %v950_v58 = vpop.f32.mrb[16].mxu0 }
 0x25f   : > { %v3927_v59 = vpop.f32.mrb[17].mxu0  ;;  %v956_v62 = vsel %vm548_vm4, %v950_v58, -1e+30 }
 0x260   : > { %v953_v60 = vpop.f32.mrb[18].mxu0  ;;  %v957_v63 = vsel %vm602_vm5, %v956_v62, -inf }
 0x261   : > { %v3928_v61 = vpop.f32.mrb[19].mxu0 }
 0x26f   : > { %727 = vrot.lane.b32.xlu0 %v4408_v26, %s4227_s14  ;;  %s3684_s14 = sshll.u32 %s4326_s29, 7  ;;  %s4234_s29 = smov [#allocation3]  }
 0x270   : > { %s5200_s22 = scalar_lea.hbm %s5256_s13, %s3684_s14  ;;  %s4164_s30 = sshll.u32 %s4234_s29, 4  ;;  %s4165_s30 = int_to_ptr.vmem [resolvable:$false] %s4164_s30 }
 0x271   : > { %s4166_s20 = scalar_lea.vmem %s4165_s30, 256 }
 0x27e   : > { %958 = vmax.xlane.f32.xlu1 %v957_v63  ;;  %v4011_v63 = vld [vmem:[%s5246_s3 + $0x18] sm:$0xff]  }
 0x28f   : > { %967 = vrot.lane.b32.xlu1 %v4408_v26, %s4233_s23  ;;  %s3374_s23 = scalar_lea.sflag [#allocation4], %s429_s24 }
 0x2d6   : > { %v605_v0 = vpop.xlane.xlu1 %604 }
 0x2d7   : > { %v606_v1 = vsub.f32 %v601_v41, %v605_v0 }
 0x2d9   : > { %v607_v3 = vmul.f32 1.442695, %v606_v1 }
 0x2da   : > { %v848_v19 = vpop.permute.xlu1 %847 }
 0x2db   : > { %4140 = vpow2.f32 %v607_v3  ;;  %v853_v22 = vsel %vm616_vm2, %v848_v19, 0 }
 0x2de   : > { %v718_v4 = vpop.xlane.xlu0 %717 }
 0x2df   : > { %v719_v5 = vsub.f32 %v715_v47, %v718_v4 }
 0x2e1   : > { %v720_v6 = vmul.f32 1.442695, %v719_v5 }
 0x2e3   : > { %4142 = vpow2.f32 %v720_v6 }
 0x2e5   : > { %v4141_v7 = vpop.eup %4140 }
 0x2e6   : > { %v839_v8 = vpop.xlane.xlu0 %838  ;;  %v612_v10 = vpack.c.bf16 %v4141_v7, %v4141_v7  ;;  %v609_v34 = vsel %vm602_vm5, %v4141_v7, 0.0 }
 0x2e7   : > { %v840_v12 = vsub.f32 %v836_v53, %v839_v8 }
 0x2e8   : > { %3896 = vmatmul.mubr.msk.bf16.vlgmr.msra.gmra.mrb[0].mxu1 %vm602_vm5, %v612_v10 }
 0x2e9   : > { %v841_v13 = vmul.f32 1.442695, %v840_v12  ;;  %3907 = vmatprep.mubr.msk.bf16.mxu1 %vm4226_vm1, %v4225_v11 }
 0x2ea   : > { %v728_v15 = vpop.permute.xlu0 %727 }
 0x2eb   : > { %4144 = vpow2.f32 %v841_v13  ;;  %v733_v17 = vsel %vm616_vm2, %v728_v15, 0  ;;  %v3472_v13 = vld [vmem:[%s5247_s4] ss:$0 sm:$0xff] }
 0x2ec   : > { %3906 = vmatpush3.bf16.msra.mxu1 %v733_v17 }
 0x2ed   : > { %v4143_v18 = vpop.eup %4142  ;;  %3917 = vmatprep.subr.bf16.mxu1 %v4225_v11 }
 0x2ee   : > { %v722_v20 = vsel %vm602_vm5, %v4143_v18, 0.0  ;;  %v725_v21 = vpack.c.bf16 %v4143_v18, %v4143_v18 }
 0x2ef   : > { %723 = vadd.xlane.f32.xlu0 %v722_v20 }
 0x2f0   : > { %3908 = vmatmul.mubr.msk.bf16.vlgmr.msra.gmra.mrb[4].mxu1 %vm602_vm5, %v725_v21 }
 0x2f1   : > { %3918 = vmatpush3.bf16.msra.mxu1 %v853_v22  ;;  %3919 = vmatprep.mubr.msk.bf16.mxu1 %vm4226_vm1, %v4225_v11 }
 0x2f2   : > { %3929 = vmatprep.subr.bf16.mxu1 %v4225_v11 }
 0x2f5   : > { %v4145_v23 = vpop.eup %4144 }
 0x2f6   : > { %v843_v24 = vsel %vm602_vm5, %v4145_v23, 0.0  ;;  %v846_v25 = vpack.c.bf16 %v4145_v23, %v4145_v23 }
 0x2f7   : > { %844 = vadd.xlane.f32.xlu1 %v843_v24 }
 0x2f8   : > { %3920 = vmatmul.mubr.msk.bf16.vlgmr.msra.gmra.mrb[8].mxu1 %vm602_vm5, %v846_v25 }
 0x2f9   : > { %3931 = vmatprep.mubr.msk.bf16.mxu1 %vm4226_vm1, %v4225_v11 }
 0x30b   : > { %v959_v26 = vpop.xlane.xlu1 %958 }
 0x30c   : > { %v960_v27 = vsub.f32 %v956_v62, %v959_v26  ;;  %v4010_v62 = vld [vmem:[%s5246_s3 + $0x10] sm:$0xff]  }
 0x30d   : > { %3940 = vmatpush3.bf16.msra.mxu0 %v4010_v62 }
 0x30e   : > { %v961_v28 = vmul.f32 1.442695, %v960_v27  ;;  %3941 = vmatprep.subr.bf16.mxu0 %v4225_v11 }
 0x30f   : > { %v968_v29 = vpop.permute.xlu1 %967 }
 0x310   : > { %4146 = vpow2.f32 %v961_v28  ;;  %v973_v30 = vsel %vm616_vm2, %v968_v29, 0  ;;  %v1141_v28 = vld [vmem:[%s5250_s7] sm:$0xff] }
 0x311   : > { %3930 = vmatpush3.bf16.msra.mxu1 %v973_v30  ;;  %3942 = vmatpush3.bf16.msra.mxu0 %v4011_v63  ;;  %v1142_v29 = vld [vmem:[%s5250_s7 + $0x40] sm:$0xff] }
 0x312   : > { %v3481_v30 = vcombine.high %v1141_v28, %v1142_v29 }
 0x314   : > { %1204 = vmatprep.subr.bf16.mxu1 %v3481_v30  ;;  %v4033_v30 = vld [vmem:[%s5252_s9 + $0xa8] sm:$0xff]  }
 0x31a   : > { %v4147_v31 = vpop.eup %4146 }
 0x31b   : > { %v963_v32 = vsel %vm602_vm5, %v4147_v31, 0.0  ;;  %v966_v33 = vpack.c.bf16 %v4147_v31, %v4147_v31  ;;  %v1282_v31 = vld [vmem:[%s5250_s7 + $0x48] sm:$0xff] }
 0x31c   : > { %964 = vadd.xlane.f32.xlu0 %v963_v32  ;;  %v3480_v32 = vcombine.low %v1141_v28, %v1142_v29  ;;  %v4031_v28 = vld [vmem:[%s5252_s9 + $0x20] sm:$0xff]   ;;  %v4032_v29 = vld [vmem:[%s5252_s9 + $0xe8] sm:$0xff]  }
 0x31d   : > { %3932 = vmatmul.mubr.msk.bf16.vlgmr.msra.gmra.mrb[12].mxu1 %vm602_vm5, %v966_v33 }
 0x31e   : > { %1236 = vmatprep.mubr.bf16.mxu1 %v4224_v2  ;;  %1205 = vmatpush1.bf16.msra.mxu1 %v3480_v32  ;;  %v4036_v32 = vld [vmem:[%s5252_s9 + $0xf0] sm:$0xff]  }
 0x320   : > { %610 = vadd.xlane.f32.xlu0 %v609_v34 }
 0x37c   : > { %v724_v35 = vpop.xlane.xlu0 %723 }
 0x384   : > { %v845_v43 = vpop.xlane.xlu1 %844 }
 0x3a9   : > { %v965_v36 = vpop.xlane.xlu0 %964 }
 0x3ad   : > { %v611_v37 = vpop.xlane.xlu0 %610 }
 0x3ae   : > { %4148 = vrcp.f32 %v611_v37  ;;  %v1283_v37 = vld [vmem:[%s5250_s7 + $0x88] sm:$0xff] }
 0x3af   : > { %4150 = vrcp.f32 %v724_v35  ;;  %v1143_v35 = vld [vmem:[%s5250_s7 + $0x80] sm:$0xff] }
 0x3b0   : > { %4152 = vrcp.f32 %v845_v43  ;;  %v1145_v43 = vld [vmem:[%s5250_s7 + $0x100] sm:$0xff] }
 0x3b1   : > { %4154 = vrcp.f32 %v965_v36  ;;  %v1144_v36 = vld [vmem:[%s5250_s7 + $0xc0] sm:$0xff] }
 0x3b8   : > { %v4149_v38 = vpop.eup %4148 }
 0x3b9   : > { %v4151_v46 = vpop.eup %4150 }
 0x3ba   : > { %v4153_v55 = vpop.eup %4152 }
 0x3bb   : > { %v654_v39 = vpop.f32.mrb[0].mxu1  ;;  %v4155_v0 = vpop.eup %4154 }
 0x3bc   : > { %v661_v40 = vmul.f32 %v4149_v38, %v654_v39  ;;  %v3897_v41 = vpop.f32.mrb[1].mxu1  ;;  %v3483_v38 = vcombine.high %v1143_v35, %v1144_v36  ;;  %v1284_v39 = vld [vmem:[%s5250_s7 + $0xc8] sm:$0xff] }
 0x3bd   : > { %v657_v42 = vpop.f32.mrb[2].mxu1  ;;  %v3491_v41 = vcombine.low %v1283_v37, %v1284_v39 }
 0x3be   : > { %v662_v44 = vpack.c.bf16 %v661_v40, %v661_v40  ;;  %v3898_v45 = vpop.f32.mrb[3].mxu1  ;;  %v3482_v40 = vcombine.low %v1143_v35, %v1144_v36  ;;  %v3492_v42 = vcombine.high %v1283_v37, %v1284_v39  ;;  %1206 = vmatprep.subr.bf16.mxu1 %v3483_v38  ;;  %v4039_v35 = vld [vmem:[%s5252_s9 + $0x30] sm:$0xff]   ;;  %v4040_v36 = vld [vmem:[%s5252_s9 + $0xf8] sm:$0xff]  }
 0x3bf   : > { %v1285_v45 = vld [vmem:[%s5250_s7 + $0x108] sm:$0xff]  ;;  %v4041_v37 = vld [vmem:[%s5252_s9 + $0xb8] sm:$0xff]  }
 0x3c0   : > { %664 = vst.msk [vmem:[#allocation2] sm:$0xf] %vm663_vm6, %v662_v44  ;;  %1207 = vmatpush1.bf16.msra.mxu1 %v3482_v40  ;;  %v1146_v44 = vld [vmem:[%s5250_s7 + $0x140] sm:$0xff]  ;;  %v4042_v38 = vld [vmem:[%s5252_s9 + $0x78] sm:$0xff]   ;;  %v1690_v40 = vld [vmem:[%s5250_s7 + $0x10] sm:$0xff] }
 0x3c1   : > { %v3484_v48 = vcombine.low %v1145_v43, %v1146_v44  ;;  %v4043_v39 = vld [vmem:[%s5252_s9 + $0x38] sm:$0xff]  }
 0x3c3   : > { %v769_v47 = vpop.f32.mrb[4].mxu1 }
 0x3c4   : > { %v776_v49 = vmul.f32 %v4151_v46, %v769_v47  ;;  %v3909_v50 = vpop.f32.mrb[5].mxu1  ;;  %v3485_v46 = vcombine.high %v1145_v43, %v1146_v44  ;;  %v1286_v47 = vld [vmem:[%s5250_s7 + $0x148] sm:$0xff]  ;;  %v4044_v44 = vld [vmem:[%s5252_s9 + $0x140] sm:$0xff]  }
 0x3c5   : > { %v772_v51 = vpop.f32.mrb[6].mxu1  ;;  %v3494_v50 = vcombine.high %v1285_v45, %v1286_v47 }
 0x3c6   : > { %v3687_v53 = vpack.c.bf16 %v776_v49, %v776_v49  ;;  %v3910_v54 = vpop.f32.mrb[7].mxu1  ;;  %v3493_v49 = vcombine.low %v1285_v45, %v1286_v47  ;;  %1208 = vmatprep.subr.bf16.mxu1 %v3485_v46  ;;  %v1147_v51 = vld [vmem:[%s5250_s7 + $0x180] sm:$0xff] }
 0x3c7   : > { %1209 = vmatpush1.bf16.msra.mxu1 %v3484_v48  ;;  %v3487_v54 = vcombine.high %v1147_v51, %v1148_v52  ;;  %v1149_v45 = vld [vmem:[%s5251_s8] sm:$0x3]  ;;  %v1289_v46 = vld [vmem:[%s5251_s8 + $0x2] sm:$0x3] }
 0x3c8   : > { %781 = vrot.lane.b32.xlu1 %v3687_v53, %s4231_s21  ;;  %v1287_v53 = vld [vmem:[%s5250_s7 + $0x188] sm:$0xff]  ;;  %v1154_v47 = vrot.slane %v1149_v45, %v4394_v14  ;;  %v1294_v48 = vrot.slane %v1289_v46, %v4394_v14 }
 0x3c9   : > { %1210 = vmatprep.subr.bf16.mxu1 %v3487_v54 }
 0x3cb   : > { %v889_v56 = vpop.f32.mrb[8].mxu1 }
 0x3cc   : > { %v896_v57 = vmul.f32 %v4153_v55, %v889_v56  ;;  %v3921_v58 = vpop.f32.mrb[9].mxu1  ;;  %v1288_v55 = vld [vmem:[%s5250_s7 + $0x1c8] sm:$0xff]  ;;  %v3486_v56 = vcombine.low %v1147_v51, %v1148_v52 }
 0x3cd   : > { %v892_v59 = vpop.f32.mrb[10].mxu1  ;;  %v3496_v58 = vcombine.high %v1287_v53, %v1288_v55 }
 0x3ce   : > { %v3688_v60 = vpack.c.bf16 %v896_v57, %v896_v57  ;;  %v3922_v61 = vpop.f32.mrb[11].mxu1  ;;  %v3495_v57 = vcombine.low %v1287_v53, %v1288_v55  ;;  %1211 = vmatpush1.bf16.msra.mxu1 %v3486_v56  ;;  %v4012_v59 = vld [vmem:[%s5252_s9 + $0xc0] sm:$0xff]  }
 0x3cf   : > { %3711 = vmatprep.subr.bf16.mxu1 %v4012_v59 }
 0x3d0   : > { %901 = vrot.lane.b32.xlu0 %v3688_v60, %s4229_s19  ;;  %v4014_v60 = vld [vmem:[%s5252_s9 + $0x40] sm:$0xff]   ;;  %s3387_s19 = sshll.u32 %s431_s17, 4  ;;  %s5202_s19 = int_to_ptr.vmem [resolvable:$true] %s3387_s19 }
 0x3d1   : > { %s4160_s16 = scalar_lea.vmem %s5202_s19, 128  ;;  %p4167_p0 = scmp.lt.s32.totalorder %s5202_s19, %s4165_s30 }
 0x3d2   : > { %p4161_p11 = scmp.ne.s32.totalorder %s5202_s19, %s4160_s16  ;;  %p4168_p1 = scmp.lt.s32.totalorder %s4166_s20, %s4160_s16 }
 0x3d4   : > { %p4162_p12 = pnand %p4161_p11, %p4343_p5  ;;  %p4169_p2 = por %p4168_p1, %p4167_p0 }
 0x3d6   : > { %p4163_p13 = pneg %p4162_p12 }
 0x3d8   : > { %p4170_p3 = pnand %p4169_p2, %p4163_p13 }
 0x3f0   : > { %v1009_v1 = vpop.f32.mrb[12].mxu1 }
 0x3f1   : > { %v1016_v3 = vmul.f32 %v4155_v0, %v1009_v1  ;;  %v3933_v4 = vpop.f32.mrb[13].mxu1  ;;  %v3478_v1 = vld [vmem:[%s5248_s5] ss:$0 sm:$0xff] }
 0x3f2   : > { %v1012_v5 = vpop.f32.mrb[14].mxu1  ;;  %v3479_v4 = vld [vmem:[%s5249_s6] ss:$0 sm:$0xff] }
 0x3f3   : > { %v3689_v6 = vpack.c.bf16 %v1016_v3, %v1016_v3  ;;  %v3934_v7 = vpop.f32.mrb[15].mxu1 }
 0x3f4   : > { %v4013_v7 = vld [vmem:[%s5252_s9 + $0x80] sm:$0xff]  }
 0x3f5   : > { %1021 = vrot.lane.b32.xlu1 %v3689_v6, %s4230_s15 }
 0x43a   : > { %v782_v8 = vpop.permute.xlu1 %781 }
 0x43b   : > { %785 = vst.msk [vmem:[#allocation2] sm:$0xf] %vm784_vm7, %v782_v8  ;;  %v4015_v8 = vld [vmem:[%s5252_s9] sm:$0xff]  }
 0x442   : > { %v902_v10 = vpop.permute.xlu0 %901 }
 0x443   : > { %905 = vst.msk [vmem:[#allocation2] sm:$0xf] %vm904_vm8, %v902_v10 }
 0x467   : > { %v1022_v12 = vpop.permute.xlu1 %1021 }
 0x468   : > { %1025 = vst.msk [vmem:[#allocation2] sm:$0xf] %vm1024_vm9, %v1022_v12  ;;  %v4016_v12 = vld [vmem:[%s5252_s9 + $0xc8] sm:$0xff]  }
 0x46f   : > { %v1026_v11 = vld [vmem:[#allocation2] sm:$0xf] }
 0x470   : > { %3944 = vmatmul.mubr.msk.bf16.vlgmr.msra.gmra.mrb[20].mxu0 %vm499_vm0, %v1026_v11  ;;  %v4018_v11 = vld [vmem:[%s5252_s9 + $0x48] sm:$0xff]  }
 0x471   : > { %1373 = vmatprep.mubr.bf16.mxu0 %v4224_v2 }
 0x543   : > { %v1103_v15 = vpop.f32.mrb[20].mxu0 }
 0x544   : > { %v1104_v17 = vadd.f32 %v3472_v13, %v1103_v15  ;;  %v3945_v18 = vpop.f32.mrb[21].mxu0  ;;  %v4017_v13 = vld [vmem:[%s5252_s9 + $0x88] sm:$0xff]  }
 0x545   : > { %v1106_v19 = vpop.f32.mrb[22].mxu0  ;;  %v4019_v15 = vld [vmem:[%s5252_s9 + $0x8] sm:$0xff]   ;;  %v4022_v18 = vld [vmem:[%s5252_s9 + $0x50] sm:$0xff]  }
 0x546   : > { %v3946_v20 = vpop.f32.mrb[23].mxu0  ;;  %v1109_v21 = vadd.f32 %v1104_v17, %v4383_v9  ;;  %v1281_v9 = vld [vmem:[%s5250_s7 + $0x8] sm:$0xff]  ;;  %v4020_v17 = vld [vmem:[%s5252_s9 + $0xd0] sm:$0xff]  }
 0x547   : > { %v3489_v33 = vcombine.low %v1281_v9, %v1282_v31  ;;  %v3490_v34 = vcombine.high %v1281_v9, %v1282_v31  ;;  %v4021_v19 = vld [vmem:[%s5252_s9 + $0x90] sm:$0xff]   ;;  %v4034_v9 = vld [vmem:[%s5252_s9 + $0x68] sm:$0xff]  }
 0x548   : > { %v1112_v22 = vsel %vm499_vm0, %v1109_v21, 0.0  ;;  %v4023_v20 = vld [vmem:[%s5252_s9 + $0x10] sm:$0xff]   ;;  %v4035_v31 = vld [vmem:[%s5252_s9 + $0x28] sm:$0xff]  }
 0x549   : > { %1113 = vadd.xlane.f32.xlu1 %v1112_v22  ;;  %1341 = vmatprep.subr.bf16.mxu0 %v3490_v34  ;;  %v4026_v22 = vld [vmem:[%s5252_s9 + $0x58] sm:$0xff]   ;;  %v4038_v34 = vld [vmem:[%s5252_s9 + $0x70] sm:$0xff]  }
 0x54a   : > { %1342 = vmatpush1.bf16.msra.mxu0 %v3489_v33  ;;  %v4037_v33 = vld [vmem:[%s5252_s9 + $0xb0] sm:$0xff]  }
 0x54b   : > { %1343 = vmatprep.subr.bf16.mxu0 %v3492_v42 }
 0x54e   : > { %1344 = vmatpush1.bf16.msra.mxu0 %v3491_v41  ;;  %v1691_v41 = vld [vmem:[%s5250_s7 + $0x50] sm:$0xff] }
 0x54f   : > { %1345 = vmatprep.subr.bf16.mxu0 %v3494_v50  ;;  %v3531_v42 = vcombine.high %v1690_v40, %v1691_v41  ;;  %v3530_v43 = vcombine.low %v1690_v40, %v1691_v41  ;;  %v1298_v50 = vrot.slane %v1289_v46, %v4400_v16  ;;  %v1971_v40 = vld [vmem:[%s5250_s7 + $0x1d8] sm:$0xff] }
 0x550   : > { %v4051_v46 = vld [vmem:[%s5252_s9 + $0x118] sm:$0xff]  }
 0x552   : > { %1346 = vmatpush1.bf16.msra.mxu0 %v3493_v49  ;;  %v1158_v49 = vrot.slane %v1149_v45, %v4400_v16  ;;  %v4050_v45 = vld [vmem:[%s5252_s9 + $0x158] sm:$0xff]  }
 0x553   : > { %1347 = vmatprep.subr.bf16.mxu0 %v3496_v58 }
 0x556   : > { %1348 = vmatpush1.bf16.msra.mxu0 %v3495_v57 }
 0x557   : > { %3733 = vmatprep.subr.bf16.mxu0 %v4014_v60 }
 0x5d6   : > { %v1114_v23 = vpop.xlane.xlu1 %1113 }
 0x5d7   : > { %v1116_v24 = vmul.f32 0.015625, %v1114_v23  ;;  %v4025_v23 = vld [vmem:[%s5252_s9 + $0x98] sm:$0xff]  }
 0x5d9   : > { %v1117_v25 = vsub.f32 %v1109_v21, %v1116_v24  ;;  %v4024_v21 = vld [vmem:[%s5252_s9 + $0xd8] sm:$0xff]  }
 0x5da   : > { %v4027_v24 = vld [vmem:[%s5252_s9 + $0x18] sm:$0xff]  }
 0x5db   : > { %v1118_v26 = vmul.f32 %v1117_v25, %v1117_v25 }
 0x5dd   : > { %v1119_v27 = vsel %vm499_vm0, %v1118_v26, 0.0  ;;  %v4030_v26 = vld [vmem:[%s5252_s9 + $0x60] sm:$0xff]  }
 0x5de   : > { %1120 = vadd.xlane.f32.xlu0 %v1119_v27  ;;  %v4029_v27 = vld [vmem:[%s5252_s9 + $0xa0] sm:$0xff]  }
 0x66b   : > { %v1121_v61 = vpop.xlane.xlu0 %1120 }
 0x66c   : > { %v1122_v62 = vmul.f32 0.015625, %v1121_v61 }
 0x66e   : > { %v1123_v63 = vadd.f32 1e-05, %v1122_v62 }
 0x670   : > { %4156 = vrsqrt.f32 %v1123_v63 }
 0x67a   : > { %v4157_v0 = vpop.eup %4156 }
 0x67b   : > { %v1125_v3 = vmul.f32 %v4157_v0, %v1117_v25  ;;  %v4028_v25 = vld [vmem:[%s5252_s9 + $0xe0] sm:$0xff]  }
 0x67d   : > { %v1132_v5 = vmul.f32 %v3478_v1, %v1125_v3 }
 0x67f   : > { %v4565_v6 = vadd.f32 %v3479_v4, %v1132_v5  ;;  %v1692_v4 = vld [vmem:[%s5250_s7 + $0x90] sm:$0xff] }
 0x680   : > { %v1693_v5 = vld [vmem:[%s5250_s7 + $0xd0] sm:$0xff] }
 0x681   : > { %v4575_v10 = vpack.c.bf16 %v4565_v6, %v4565_v6 }
 0x683   : > { %3488 = vmatmul.mubr.msk.bf16.vlgmr.msra.gmra.mrb[16].mxu1 %vm499_vm0, %v4575_v10  ;;  %3497 = vmatmul.mubr.msk.bf16.vlgmr.msra.gmra.mrb[24].mxu0 %vm499_vm0, %v4575_v10 }
 0x684   : > { %3712 = vmatpush3.bf16.msra.mxu1 %v4013_v7  ;;  %3734 = vmatpush3.bf16.msra.mxu0 %v4015_v8 }
 0x685   : > { %3713 = vmatprep.subr.bf16.mxu1 %v4016_v12  ;;  %3735 = vmatprep.subr.bf16.mxu0 %v4018_v11 }
 0x688   : > { %3714 = vmatpush3.bf16.msra.mxu1 %v4017_v13  ;;  %3736 = vmatpush3.bf16.msra.mxu0 %v4019_v15  ;;  %v3533_v13 = vcombine.high %v1692_v4, %v1693_v5  ;;  %v4045_v15 = vld [vmem:[%s5252_s9 + $0x100] sm:$0xff]  }
 0x689   : > { %3715 = vmatprep.subr.bf16.mxu1 %v4020_v17  ;;  %3737 = vmatprep.subr.bf16.mxu0 %v4022_v18  ;;  %v1694_v17 = vld [vmem:[%s5250_s7 + $0x110] sm:$0xff] }
 0x68a   : > { %v1695_v18 = vld [vmem:[%s5250_s7 + $0x150] sm:$0xff] }
 0x68c   : > { %3716 = vmatpush3.bf16.msra.mxu1 %v4021_v19  ;;  %3738 = vmatpush3.bf16.msra.mxu0 %v4023_v20  ;;  %v4046_v19 = vld [vmem:[%s5252_s9 + $0x148] sm:$0xff]   ;;  %v3532_v20 = vcombine.low %v1692_v4, %v1693_v5  ;;  %v4069_v5 = vld [vmem:[%s5252_s9 + $0x1a0] sm:$0xff]  }
 0x68d   : > { %3717 = vmatprep.subr.bf16.mxu1 %v4024_v21  ;;  %3739 = vmatprep.subr.bf16.mxu0 %v4026_v22  ;;  %v3535_v21 = vcombine.high %v1694_v17, %v1695_v18  ;;  %v4047_v22 = vld [vmem:[%s5252_s9 + $0x108] sm:$0xff]  }
 0x690   : > { %3718 = vmatpush3.bf16.msra.mxu1 %v4025_v23  ;;  %3740 = vmatpush3.bf16.msra.mxu0 %v4027_v24  ;;  %v1696_v23 = vld [vmem:[%s5250_s7 + $0x190] sm:$0xff] }
 0x691   : > { %3719 = vmatprep.subr.bf16.mxu1 %v4028_v25  ;;  %3741 = vmatprep.subr.bf16.mxu0 %v4030_v26  ;;  %v1697_v24 = vld [vmem:[%s5250_s7 + $0x1d0] sm:$0xff]  ;;  %v3534_v26 = vcombine.low %v1694_v17, %v1695_v18  ;;  %v4834_v17 = vld [vmem:[%s5250_s7 + $0x28] sm:$0xff] }
 0x692   : > { %v4048_v25 = vld [vmem:[%s5252_s9 + $0x150] sm:$0xff]   ;;  %v4839_v18 = vld [vmem:[%s5250_s7 + $0x68] sm:$0xff] }
 0x694   : > { %3720 = vmatpush3.bf16.msra.mxu1 %v4029_v27  ;;  %3742 = vmatpush3.bf16.msra.mxu0 %v4031_v28  ;;  %v3537_v27 = vcombine.high %v1696_v23, %v1697_v24  ;;  %v1964_v28 = vld [vmem:[%s5250_s7 + $0x18] sm:$0xff] }
 0x695   : > { %3721 = vmatprep.subr.bf16.mxu1 %v4032_v29  ;;  %3743 = vmatprep.subr.bf16.mxu0 %v4034_v9  ;;  %v1965_v29 = vld [vmem:[%s5250_s7 + $0x58] sm:$0xff]  ;;  %v3536_v9 = vcombine.low %v1696_v23, %v1697_v24 }
 0x698   : > { %3722 = vmatpush3.bf16.msra.mxu1 %v4033_v30  ;;  %3744 = vmatpush3.bf16.msra.mxu0 %v4035_v31  ;;  %v3556_v30 = vcombine.high %v1964_v28, %v1965_v29  ;;  %v1966_v31 = vld [vmem:[%s5250_s7 + $0x98] sm:$0xff] }
 0x699   : > { %3723 = vmatprep.subr.bf16.mxu1 %v4036_v32  ;;  %3745 = vmatprep.subr.bf16.mxu0 %v4038_v34  ;;  %v1967_v32 = vld [vmem:[%s5250_s7 + $0xd8] sm:$0xff] }
 0x69a   : > { %v3558_v34 = vcombine.high %v1966_v31, %v1967_v32 }
 0x69c   : > { %3724 = vmatpush3.bf16.msra.mxu1 %v4037_v33  ;;  %3746 = vmatpush3.bf16.msra.mxu0 %v4039_v35  ;;  %v3555_v33 = vcombine.low %v1964_v28, %v1965_v29  ;;  %v1968_v35 = vld [vmem:[%s5250_s7 + $0x118] sm:$0xff] }
 0x69d   : > { %3725 = vmatprep.subr.bf16.mxu1 %v4040_v36  ;;  %3747 = vmatprep.subr.bf16.mxu0 %v4042_v38  ;;  %v1969_v36 = vld [vmem:[%s5250_s7 + $0x158] sm:$0xff] }
 0x69e   : > { %v3560_v38 = vcombine.high %v1968_v35, %v1969_v36  ;;  %v3559_v41 = vcombine.low %v1968_v35, %v1969_v36 }
 0x6a0   : > { %3726 = vmatpush3.bf16.msra.mxu1 %v4041_v37  ;;  %3748 = vmatpush3.bf16.msra.mxu0 %v4043_v39  ;;  %v3557_v37 = vcombine.low %v1966_v31, %v1967_v32  ;;  %v1970_v39 = vld [vmem:[%s5250_s7 + $0x198] sm:$0xff]  ;;  %v1698_v31 = vld [vmem:[%s5251_s8 + $0x4] sm:$0x3] }
 0x6a1   : > { %1750 = vmatprep.subr.bf16.mxu1 %v3531_v42  ;;  %3755 = vmatprep.subr.bf16.mxu0 %v4044_v44  ;;  %v3562_v42 = vcombine.high %v1970_v39, %v1971_v40  ;;  %v4049_v44 = vld [vmem:[%s5252_s9 + $0x110] sm:$0xff]   ;;  %v1703_v32 = vrot.slane %v1698_v31, %v4394_v14 }
 0x756   : > { %v1238_v51 = vpop.f32.mrb[16].mxu1  ;;  %v1375_v52 = vpop.f32.mrb[24].mxu0 }
 0x757   : > { %v1239_v53 = vadd.f32 %v1238_v51, %v1154_v47  ;;  %v1376_v54 = vadd.f32 %v1375_v52, %v1294_v48  ;;  %v1240_v55 = vpop.f32.mrb[17].mxu1  ;;  %v1377_v56 = vpop.f32.mrb[25].mxu0  ;;  %v4052_v47 = vld [vmem:[%s5252_s9 + $0x160] sm:$0xff]   ;;  %v4057_v51 = vld [vmem:[%s5252_s9 + $0x1c8] sm:$0xff]  }
 0x758   : > { %v1241_v57 = vadd.f32 %v1240_v55, %v1158_v49  ;;  %v1378_v58 = vadd.f32 %v1377_v56, %v1298_v50  ;;  %v1242_v59 = vpop.f32.mrb[18].mxu1  ;;  %v1379_v60 = vpop.f32.mrb[26].mxu0  ;;  %v4053_v48 = vld [vmem:[%s5252_s9 + $0x1c0] sm:$0xff]   ;;  %v4056_v52 = vld [vmem:[%s5252_s9 + $0x168] sm:$0xff]   ;;  %v4060_v55 = vld [vmem:[%s5252_s9 + $0x170] sm:$0xff]  }
 0x759   : > { %v1245_v61 = vmax.f32 %v1239_v53, 0.0  ;;  %v1382_v62 = vmax.f32 %v1376_v54, 0.0  ;;  %v1243_v63 = vpop.f32.mrb[19].mxu1  ;;  %v1380_v0 = vpop.f32.mrb[27].mxu0  ;;  %v4054_v49 = vld [vmem:[%s5252_s9 + $0x120] sm:$0xff]   ;;  %v4059_v53 = vld [vmem:[%s5252_s9 + $0x188] sm:$0xff]  }
 0x75a   : > { %v1246_v1 = vmax.f32 %v1241_v57, 0.0  ;;  %v1383_v3 = vmax.f32 %v1378_v58, 0.0  ;;  %v4055_v50 = vld [vmem:[%s5252_s9 + $0x180] sm:$0xff]   ;;  %v4058_v54 = vld [vmem:[%s5252_s9 + $0x128] sm:$0xff]   ;;  %v4061_v56 = vld [vmem:[%s5252_s9 + $0x1d0] sm:$0xff]  }
 0x75b   : > { %v1247_v12 = vpack.c.bf16 %v1245_v61, %v1245_v61  ;;  %v1384_v11 = vpack.c.bf16 %v1382_v62, %v1382_v62  ;;  %v4062_v57 = vld [vmem:[%s5252_s9 + $0x130] sm:$0xff]   ;;  %v4064_v59 = vld [vmem:[%s5252_s9 + $0x178] sm:$0xff]   ;;  %v2238_v63 = vld [vmem:[%s5250_s7 + $0x20] sm:$0xff] }
 0x75c   : > { %v1248_v7 = vpack.c.bf16 %v1246_v1, %v1246_v1  ;;  %v1385_v8 = vpack.c.bf16 %v1383_v3, %v1383_v3  ;;  %v4063_v58 = vld [vmem:[%s5252_s9 + $0x190] sm:$0xff]   ;;  %v4065_v60 = vld [vmem:[%s5252_s9 + $0x1d8] sm:$0xff]   ;;  %v2239_v0 = vld [vmem:[%s5250_s7 + $0x60] sm:$0xff] }
 0x75d   : > { %v4066_v61 = vld [vmem:[%s5252_s9 + $0x138] sm:$0xff]   ;;  %v4068_v1 = vld [vmem:[%s5252_s9 + $0x1e0] sm:$0xff]   ;;  %v3581_v3 = vcombine.high %v2238_v63, %v2239_v0  ;;  %v3580_v4 = vcombine.low %v2238_v63, %v2239_v0 }
 0x75e   : > { %1546 = vmatprep.mubr.bf16.mxu1 %v1385_v8  ;;  %1682 = vmatprep.mubr.bf16.mxu0 %v1248_v7  ;;  %v4067_v62 = vld [vmem:[%s5252_s9 + $0x198] sm:$0xff]   ;;  %v4070_v7 = vld [vmem:[%s5252_s9 + $0x1e8] sm:$0xff]  }
 0x75f   : > { %1547 = vmatmul.mubr.bf16.vlgmr.msra.gmra.mrb[20].mxu1 %v1384_v11  ;;  %1683 = vmatmul.mubr.bf16.vlgmr.msra.gmra.mrb[28].mxu0 %v1247_v12  ;;  %v4071_v8 = vld [vmem:[%s5252_s9 + $0x1a8] sm:$0xff]   ;;  %v4072_v12 = vld [vmem:[%s5252_s9 + $0x1f0] sm:$0xff]  }
 0x760   : > { %1751 = vmatpush1.bf16.msra.mxu1 %v3530_v43  ;;  %1782 = vmatprep.mubr.bf16.mxu1 %v4224_v2  ;;  %v3561_v43 = vcombine.low %v1970_v39, %v1971_v40  ;;  %v4073_v11 = vld [vmem:[%s5252_s9 + $0x1b0] sm:$0xff]  }
 0x761   : > { %1752 = vmatprep.subr.bf16.mxu1 %v3533_v13  ;;  %3756 = vmatpush3.bf16.msra.mxu0 %v4045_v15  ;;  %v4074_v13 = vld [vmem:[%s5252_s9 + $0x1f8] sm:$0xff]  }
 0x762   : > { %3757 = vmatprep.subr.bf16.mxu0 %v4046_v19  ;;  %v4075_v15 = vld [vmem:[%s5252_s9 + $0x1b8] sm:$0xff]   ;;  %v3606_v19 = vcombine.high %v4834_v17, %v4839_v18 }
 0x764   : > { %1753 = vmatpush1.bf16.msra.mxu1 %v3532_v20  ;;  %v3605_v20 = vcombine.low %v4834_v17, %v4839_v18  ;;  %v4080_v17 = vld [vmem:[%s5252_s9 + $0x250] sm:$0xff]  }
 0x765   : > { %1754 = vmatprep.subr.bf16.mxu1 %v3535_v21  ;;  %3758 = vmatpush3.bf16.msra.mxu0 %v4047_v22 }
 0x766   : > { %3759 = vmatprep.subr.bf16.mxu0 %v4048_v25 }
 0x768   : > { %1755 = vmatpush1.bf16.msra.mxu1 %v3534_v26 }
 0x769   : > { %1756 = vmatprep.subr.bf16.mxu1 %v3537_v27  ;;  %3760 = vmatpush3.bf16.msra.mxu0 %v4049_v44 }
 0x76a   : > { %3761 = vmatprep.subr.bf16.mxu0 %v4050_v45 }
 0x76c   : > { %1757 = vmatpush1.bf16.msra.mxu1 %v3536_v9 }
 0x76d   : > { %2024 = vmatprep.subr.bf16.mxu1 %v3556_v30  ;;  %3762 = vmatpush3.bf16.msra.mxu0 %v4051_v46 }
 0x76e   : > { %3763 = vmatprep.subr.bf16.mxu0 %v4052_v47  ;;  %v2242_v47 = vld [vmem:[%s5250_s7 + $0x120] sm:$0xff] }
 0x76f   : > { %3538 = vmatmul.mubr.msk.bf16.vlgmr.msra.gmra.mrb[24].mxu1 %vm499_vm0, %v4575_v10 }
 0x770   : > { %2025 = vmatpush1.bf16.msra.mxu1 %v3555_v33  ;;  %2056 = vmatprep.mubr.bf16.mxu1 %v4224_v2  ;;  %v1707_v33 = vrot.slane %v1698_v31, %v4400_v16  ;;  %v4084_v31 = vld [vmem:[%s5252_s9 + $0x260] sm:$0xff]  }
 0x771   : > { %2026 = vmatprep.subr.bf16.mxu1 %v3558_v34  ;;  %3764 = vmatpush3.bf16.msra.mxu0 %v4054_v49 }
 0x772   : > { %3765 = vmatprep.subr.bf16.mxu0 %v4056_v52  ;;  %v2244_v52 = vld [vmem:[%s5250_s7 + $0x1a0] sm:$0xff] }
 0x774   : > { %2027 = vmatpush1.bf16.msra.mxu1 %v3557_v37 }
 0x775   : > { %2028 = vmatprep.subr.bf16.mxu1 %v3560_v38  ;;  %3766 = vmatpush3.bf16.msra.mxu0 %v4058_v54 }
 0x776   : > { %3767 = vmatprep.subr.bf16.mxu0 %v4060_v55 }
 0x778   : > { %2029 = vmatpush1.bf16.msra.mxu1 %v3559_v41 }
 0x779   : > { %2030 = vmatprep.subr.bf16.mxu1 %v3562_v42  ;;  %3768 = vmatpush3.bf16.msra.mxu0 %v4062_v57  ;;  %v2240_v42 = vld [vmem:[%s5250_s7 + $0xa0] sm:$0xff] }
 0x77a   : > { %3769 = vmatprep.subr.bf16.mxu0 %v4064_v59 }
 0x77c   : > { %2031 = vmatpush1.bf16.msra.mxu1 %v3561_v43  ;;  %v2241_v43 = vld [vmem:[%s5250_s7 + $0xe0] sm:$0xff] }
 0x77d   : > { %3777 = vmatprep.subr.bf16.mxu1 %v4053_v48  ;;  %3770 = vmatpush3.bf16.msra.mxu0 %v4066_v61  ;;  %v3583_v46 = vcombine.high %v2240_v42, %v2241_v43  ;;  %v2243_v48 = vld [vmem:[%s5250_s7 + $0x160] sm:$0xff]  ;;  %v3582_v49 = vcombine.low %v2240_v42, %v2241_v43  ;;  %v4095_v42 = vld [vmem:[%s5252_s9 + $0x290] sm:$0xff]   ;;  %v4096_v43 = vld [vmem:[%s5252_s9 + $0x278] sm:$0xff]  }
 0x77e   : > { %2298 = vmatprep.subr.bf16.mxu0 %v3581_v3  ;;  %v3584_v55 = vcombine.low %v2242_v47, %v2243_v48  ;;  %v4076_v3 = vld [vmem:[%s5252_s9 + $0x240] sm:$0xff]  }
 0x77f   : > { %3563 = vmatmul.mubr.msk.bf16.vlgmr.msra.gmra.mrb[28].mxu1 %vm499_vm0, %v4575_v10 }
 0x780   : > { %3778 = vmatpush3.bf16.msra.mxu1 %v4055_v50  ;;  %v1972_v50 = vld [vmem:[%s5251_s8 + $0x6] sm:$0x3] }
 0x781   : > { %3779 = vmatprep.subr.bf16.mxu1 %v4057_v51  ;;  %v3585_v51 = vcombine.high %v2242_v47, %v2243_v48  ;;  %v1977_v54 = vrot.slane %v1972_v50, %v4394_v14  ;;  %v2786_v47 = vld [vmem:[%s5250_s7 + $0x30] sm:$0xff] }
 0x782   : > { %v2787_v48 = vld [vmem:[%s5250_s7 + $0x70] sm:$0xff] }
 0x784   : > { %3780 = vmatpush3.bf16.msra.mxu1 %v4059_v53  ;;  %v2245_v53 = vld [vmem:[%s5250_s7 + $0x1e0] sm:$0xff] }
 0x785   : > { %3781 = vmatprep.subr.bf16.mxu1 %v4061_v56  ;;  %v1981_v56 = vrot.slane %v1972_v50, %v4400_v16  ;;  %v3587_v57 = vcombine.high %v2244_v52, %v2245_v53  ;;  %v3586_v63 = vcombine.low %v2244_v52, %v2245_v53  ;;  %v3631_v50 = vcombine.high %v2786_v47, %v2787_v48  ;;  %v4101_v52 = vld [vmem:[%s5252_s9 + $0x2a0] sm:$0xff]   ;;  %v4102_v53 = vld [vmem:[%s5252_s9 + $0x2e8] sm:$0xff]  }
 0x788   : > { %3782 = vmatpush3.bf16.msra.mxu1 %v4063_v58 }
 0x789   : > { %3783 = vmatprep.subr.bf16.mxu1 %v4065_v60 }
 0x78c   : > { %3784 = vmatpush3.bf16.msra.mxu1 %v4067_v62 }
 0x78d   : > { %3785 = vmatprep.subr.bf16.mxu1 %v4068_v1 }
 0x790   : > { %3786 = vmatpush3.bf16.msra.mxu1 %v4069_v5  ;;  %v2514_v5 = vld [vmem:[%s5250_s7 + $0xa8] sm:$0xff] }
 0x791   : > { %3787 = vmatprep.subr.bf16.mxu1 %v4070_v7  ;;  %v2515_v7 = vld [vmem:[%s5250_s7 + $0xe8] sm:$0xff] }
 0x794   : > { %3788 = vmatpush3.bf16.msra.mxu1 %v4071_v8 }
 0x795   : > { %3789 = vmatprep.subr.bf16.mxu1 %v4072_v12 }
 0x798   : > { %3790 = vmatpush3.bf16.msra.mxu1 %v4073_v11  ;;  %v3608_v11 = vcombine.high %v2514_v5, %v2515_v7 }
 0x799   : > { %3791 = vmatprep.subr.bf16.mxu1 %v4074_v13  ;;  %v4077_v13 = vld [vmem:[%s5252_s9 + $0x200] sm:$0xff]  }
 0x79c   : > { %3792 = vmatpush3.bf16.msra.mxu1 %v4075_v15  ;;  %v2516_v15 = vld [vmem:[%s5250_s7 + $0x128] sm:$0xff] }
 0x79d   : > { %2572 = vmatprep.subr.bf16.mxu1 %v3606_v19  ;;  %v2517_v19 = vld [vmem:[%s5250_s7 + $0x168] sm:$0xff] }
 0x79e   : > { %v3609_v18 = vcombine.low %v2516_v15, %v2517_v19 }
 0x832   : > { %v3727_v21 = vpop.f32.mrb[20].mxu1  ;;  %v3749_v22 = vpop.f32.mrb[28].mxu0 }
 0x833   : > { %v3728_v23 = vpop.f32.mrb[21].mxu1  ;;  %v3750_v24 = vpop.f32.mrb[29].mxu0 }
 0x834   : > { %v3729_v25 = vadd.f32 %v3728_v23, %v3727_v21  ;;  %v3751_v26 = vadd.f32 %v3750_v24, %v3749_v22  ;;  %v3730_v27 = vpop.f32.mrb[22].mxu1  ;;  %v3752_v28 = vpop.f32.mrb[30].mxu0  ;;  %v4078_v21 = vld [vmem:[%s5252_s9 + $0x248] sm:$0xff]   ;;  %v3607_v22 = vcombine.low %v2514_v5, %v2515_v7  ;;  %v3610_v23 = vcombine.high %v2516_v15, %v2517_v19 }
 0x835   : > { %v3731_v29 = vpop.f32.mrb[23].mxu1  ;;  %v3753_v9 = vpop.f32.mrb[31].mxu0  ;;  %v4079_v24 = vld [vmem:[%s5252_s9 + $0x208] sm:$0xff]   ;;  %v4081_v28 = vld [vmem:[%s5252_s9 + $0x210] sm:$0xff]  }
 0x836   : > { %v4845_v30 = vadd.f32 %v3751_v26, %v3729_v25  ;;  %v2518_v25 = vld [vmem:[%s5250_s7 + $0x1a8] sm:$0xff]  ;;  %v4082_v29 = vld [vmem:[%s5252_s9 + $0x258] sm:$0xff]  }
 0x837   : > { %v2519_v26 = vld [vmem:[%s5250_s7 + $0x1e8] sm:$0xff]  ;;  %v4083_v9 = vld [vmem:[%s5252_s9 + $0x218] sm:$0xff]  }
 0x838   : > { %v3611_v27 = vcombine.low %v2518_v25, %v2519_v26  ;;  %v2246_v7 = vld [vmem:[%s5251_s8 + $0x8] sm:$0x3] }
 0x842   : > { %v1784_v34 = vpop.f32.mrb[24].mxu1 }
 0x843   : > { %v1785_v35 = vadd.f32 %v1784_v34, %v1703_v32  ;;  %v1786_v36 = vpop.f32.mrb[25].mxu1  ;;  %v4085_v32 = vld [vmem:[%s5252_s9 + $0x2c0] sm:$0xff]  }
 0x844   : > { %v1787_v37 = vadd.f32 %v1786_v36, %v1707_v33  ;;  %v1788_v38 = vpop.f32.mrb[26].mxu1  ;;  %v4086_v33 = vld [vmem:[%s5252_s9 + $0x220] sm:$0xff]   ;;  %v4088_v36 = vld [vmem:[%s5252_s9 + $0x268] sm:$0xff]  }
 0x845   : > { %v1791_v39 = vmax.f32 %v1785_v35, 0.0  ;;  %v1789_v40 = vpop.f32.mrb[27].mxu1  ;;  %v4087_v34 = vld [vmem:[%s5252_s9 + $0x280] sm:$0xff]   ;;  %v4089_v35 = vld [vmem:[%s5252_s9 + $0x2c8] sm:$0xff]  }
 0x846   : > { %v1792_v41 = vmax.f32 %v1787_v37, 0.0  ;;  %v4091_v37 = vld [vmem:[%s5252_s9 + $0x288] sm:$0xff]   ;;  %v4093_v40 = vld [vmem:[%s5252_s9 + $0x2d0] sm:$0xff]  }
 0x847   : > { %v1793_v45 = vpack.c.bf16 %v1791_v39, %v1791_v39  ;;  %v4090_v38 = vld [vmem:[%s5252_s9 + $0x228] sm:$0xff]   ;;  %v4092_v39 = vld [vmem:[%s5252_s9 + $0x270] sm:$0xff]  }
 0x848   : > { %v1794_v44 = vpack.c.bf16 %v1792_v41, %v1792_v41  ;;  %v4094_v41 = vld [vmem:[%s5252_s9 + $0x230] sm:$0xff]  }
 0x84a   : > { %1955 = vmatprep.mubr.bf16.mxu0 %v1794_v44  ;;  %v4097_v44 = vld [vmem:[%s5252_s9 + $0x2d8] sm:$0xff]  }
 0x84b   : > { %1956 = vmatmul.mubr.bf16.vlgmr.msra.gmra.mrb[32].mxu0 %v1793_v45  ;;  %v4098_v45 = vld [vmem:[%s5252_s9 + $0x238] sm:$0xff]  }
 0x84c   : > { %2299 = vmatpush1.bf16.msra.mxu0 %v3580_v4  ;;  %2330 = vmatprep.mubr.bf16.mxu0 %v4224_v2 }
 0x84d   : > { %2300 = vmatprep.subr.bf16.mxu0 %v3583_v46  ;;  %v4099_v46 = vld [vmem:[%s5252_s9 + $0x298] sm:$0xff]  }
 0x850   : > { %2301 = vmatpush1.bf16.msra.mxu0 %v3582_v49  ;;  %v4100_v49 = vld [vmem:[%s5252_s9 + $0x2e0] sm:$0xff]  }
 0x851   : > { %2302 = vmatprep.subr.bf16.mxu0 %v3585_v51  ;;  %v3630_v51 = vcombine.low %v2786_v47, %v2787_v48 }
 0x852   : > { %v2058_v58 = vpop.f32.mrb[28].mxu1 }
 0x853   : > { %v2059_v59 = vadd.f32 %v2058_v58, %v1977_v54  ;;  %v2060_v60 = vpop.f32.mrb[29].mxu1  ;;  %v4103_v54 = vld [vmem:[%s5252_s9 + $0x2a8] sm:$0xff]   ;;  %v4107_v58 = vld [vmem:[%s5252_s9 + $0x2b8] sm:$0xff]  }
 0x854   : > { %v2061_v61 = vadd.f32 %v2060_v60, %v1981_v56  ;;  %2303 = vmatpush1.bf16.msra.mxu0 %v3584_v55  ;;  %v2062_v62 = vpop.f32.mrb[30].mxu1  ;;  %v4104_v55 = vld [vmem:[%s5252_s9 + $0x2f0] sm:$0xff]   ;;  %v5012_v60 = vld [vmem:[%s5250_s7 + $0x78] sm:$0xff] }
 0x855   : > { %v2065_v0 = vmax.f32 %v2059_v59, 0.0  ;;  %v2063_v1 = vpop.f32.mrb[31].mxu1  ;;  %2304 = vmatprep.subr.bf16.mxu0 %v3587_v57  ;;  %v4105_v56 = vld [vmem:[%s5252_s9 + $0x2b0] sm:$0xff]   ;;  %v4106_v57 = vld [vmem:[%s5252_s9 + $0x2f8] sm:$0xff]  }
 0x856   : > { %v2066_v4 = vmax.f32 %v2061_v61, 0.0  ;;  %v5007_v59 = vld [vmem:[%s5250_s7 + $0x38] sm:$0xff] }
 0x857   : > { %v2067_v12 = vpack.c.bf16 %v2065_v0, %v2065_v0  ;;  %v3656_v61 = vcombine.high %v5007_v59, %v5012_v60  ;;  %v3655_v62 = vcombine.low %v5007_v59, %v5012_v60 }
 0x858   : > { %v2068_v8 = vpack.c.bf16 %v2066_v4, %v2066_v4  ;;  %2305 = vmatpush1.bf16.msra.mxu0 %v3586_v63 }
 0x859   : > { %3799 = vmatprep.subr.bf16.mxu0 %v4076_v3 }
 0x85a   : > { %2229 = vmatprep.mubr.bf16.mxu1 %v2068_v8  ;;  %v2251_v8 = vrot.slane %v2246_v7, %v4394_v14 }
 0x85b   : > { %3588 = vmatmul.mubr.msk.bf16.vlgmr.msra.gmra.mrb[36].mxu0 %vm499_vm0, %v4575_v10  ;;  %2230 = vmatmul.mubr.bf16.vlgmr.msra.gmra.mrb[32].mxu1 %v2067_v12  ;;  %v2255_v12 = vrot.slane %v2246_v7, %v4400_v16  ;;  %v3067_v7 = vld [vmem:[%s5250_s7 + $0x1f8] sm:$0xff] }
 0x85c   : > { %2573 = vmatpush1.bf16.msra.mxu1 %v3605_v20  ;;  %2604 = vmatprep.mubr.bf16.mxu1 %v4224_v2  ;;  %v3612_v20 = vcombine.high %v2518_v25, %v2519_v26 }
 0x85d   : > { %2574 = vmatprep.subr.bf16.mxu1 %v3608_v11  ;;  %3800 = vmatpush3.bf16.msra.mxu0 %v4077_v13 }
 0x85e   : > { %3801 = vmatprep.subr.bf16.mxu0 %v4078_v21 }
 0x860   : > { %2575 = vmatpush1.bf16.msra.mxu1 %v3607_v22 }
 0x861   : > { %2576 = vmatprep.subr.bf16.mxu1 %v3610_v23  ;;  %3802 = vmatpush3.bf16.msra.mxu0 %v4079_v24 }
 0x862   : > { %3803 = vmatprep.subr.bf16.mxu0 %v4080_v17 }
 0x864   : > { %2577 = vmatpush1.bf16.msra.mxu1 %v3609_v18 }
 0x865   : > { %2578 = vmatprep.subr.bf16.mxu1 %v3612_v20  ;;  %3804 = vmatpush3.bf16.msra.mxu0 %v4081_v28  ;;  %v2789_v28 = vld [vmem:[%s5250_s7 + $0xf0] sm:$0xff] }
 0x866   : > { %3805 = vmatprep.subr.bf16.mxu0 %v4082_v29 }
 0x868   : > { %2579 = vmatpush1.bf16.msra.mxu1 %v3611_v27  ;;  %v2788_v27 = vld [vmem:[%s5250_s7 + $0xb0] sm:$0xff] }
 0x869   : > { %3806 = vmatpush3.bf16.msra.mxu0 %v4083_v9  ;;  %3821 = vmatprep.subr.bf16.mxu1 %v4085_v32  ;;  %v2790_v32 = vld [vmem:[%s5250_s7 + $0x130] sm:$0xff] }
 0x86a   : > { %3807 = vmatprep.subr.bf16.mxu0 %v4084_v31  ;;  %v3633_v31 = vcombine.high %v2788_v27, %v2789_v28 }
 0x86b   : > { %3613 = vmatmul.mubr.msk.bf16.vlgmr.msra.gmra.mrb[36].mxu1 %vm499_vm0, %v4575_v10 }
 0x86c   : > { %3822 = vmatpush3.bf16.msra.mxu1 %v4087_v34  ;;  %v3632_v34 = vcombine.low %v2788_v27, %v2789_v28  ;;  %v4129_v27 = vld [vmem:[%s5252_s9 + $0x3d8] sm:$0xff]  }
 0x86d   : > { %3823 = vmatprep.subr.bf16.mxu1 %v4089_v35  ;;  %3808 = vmatpush3.bf16.msra.mxu0 %v4086_v33  ;;  %v2791_v33 = vld [vmem:[%s5250_s7 + $0x170] sm:$0xff]  ;;  %v2520_v35 = vld [vmem:[%s5251_s8 + $0xa] sm:$0x3]  ;;  %v4130_v28 = vld [vmem:[%s5252_s9 + $0x338] sm:$0xff]  }
 0x86e   : > { %3809 = vmatprep.subr.bf16.mxu0 %v4088_v36  ;;  %v3635_v36 = vcombine.high %v2790_v32, %v2791_v33 }
 0x870   : > { %3824 = vmatpush3.bf16.msra.mxu1 %v4091_v37  ;;  %v2792_v37 = vld [vmem:[%s5250_s7 + $0x1b0] sm:$0xff] }
 0x871   : > { %3810 = vmatpush3.bf16.msra.mxu0 %v4090_v38  ;;  %3825 = vmatprep.subr.bf16.mxu1 %v4093_v40  ;;  %v2793_v38 = vld [vmem:[%s5250_s7 + $0x1f0] sm:$0xff]  ;;  %v3634_v40 = vcombine.low %v2790_v32, %v2791_v33  ;;  %v4134_v32 = vld [vmem:[%s5252_s9 + $0x3e8] sm:$0xff]  }
 0x872   : > { %3811 = vmatprep.subr.bf16.mxu0 %v4092_v39  ;;  %v2525_v39 = vrot.slane %v2520_v35, %v4394_v14  ;;  %v3636_v48 = vcombine.low %v2792_v37, %v2793_v38  ;;  %v4135_v33 = vld [vmem:[%s5252_s9 + $0x3a8] sm:$0xff]  }
 0x874   : > { %3826 = vmatpush3.bf16.msra.mxu1 %v4095_v42  ;;  %v3637_v42 = vcombine.high %v2792_v37, %v2793_v38  ;;  %v4139_v37 = vld [vmem:[%s5252_s9 + $0x3b8] sm:$0xff]  }
 0x875   : > { %3812 = vmatpush3.bf16.msra.mxu0 %v4094_v41  ;;  %3827 = vmatprep.subr.bf16.mxu1 %v4097_v44  ;;  %v2529_v41 = vrot.slane %v2520_v35, %v4400_v16  ;;  %v4137_v35 = vld [vmem:[%s5252_s9 + $0x3b0] sm:$0xff]  }
 0x876   : > { %3813 = vmatprep.subr.bf16.mxu0 %v4096_v43 }
 0x878   : > { %3828 = vmatpush3.bf16.msra.mxu1 %v4099_v46 }
 0x879   : > { %3814 = vmatpush3.bf16.msra.mxu0 %v4098_v45  ;;  %3829 = vmatprep.subr.bf16.mxu1 %v4100_v49 }
 0x87a   : > { %2846 = vmatprep.subr.bf16.mxu0 %v3631_v50 }
 0x87c   : > { %3830 = vmatpush3.bf16.msra.mxu1 %v4101_v52 }
 0x87d   : > { %3831 = vmatprep.subr.bf16.mxu1 %v4102_v53  ;;  %v3062_v53 = vld [vmem:[%s5250_s7 + $0xb8] sm:$0xff] }
 0x880   : > { %3832 = vmatpush3.bf16.msra.mxu1 %v4103_v54  ;;  %v3063_v54 = vld [vmem:[%s5250_s7 + $0xf8] sm:$0xff] }
 0x881   : > { %3833 = vmatprep.subr.bf16.mxu1 %v4104_v55 }
 0x884   : > { %3834 = vmatpush3.bf16.msra.mxu1 %v4105_v56 }
 0x885   : > { %3835 = vmatprep.subr.bf16.mxu1 %v4106_v57  ;;  %v3658_v57 = vcombine.high %v3062_v53, %v3063_v54 }
 0x888   : > { %3836 = vmatpush3.bf16.msra.mxu1 %v4107_v58  ;;  %v4109_v58 = vld [vmem:[%s5252_s9 + $0x300] sm:$0xff]  }
 0x889   : > { %3120 = vmatprep.subr.bf16.mxu1 %v3656_v61  ;;  %v3064_v61 = vld [vmem:[%s5250_s7 + $0x138] sm:$0xff] }
 0x91e   : > { %v3771_v63 = vpop.f32.mrb[32].mxu0 }
 0x91f   : > { %v3772_v0 = vpop.f32.mrb[33].mxu0 }
 0x920   : > { %v3773_v1 = vadd.f32 %v3772_v0, %v3771_v63  ;;  %v3774_v3 = vpop.f32.mrb[34].mxu0  ;;  %v3065_v63 = vld [vmem:[%s5250_s7 + $0x178] sm:$0xff]  ;;  %v4110_v0 = vld [vmem:[%s5252_s9 + $0x348] sm:$0xff]  }
 0x921   : > { %v3775_v4 = vpop.f32.mrb[35].mxu0  ;;  %v3660_v3 = vcombine.high %v3064_v61, %v3065_v63  ;;  %v3659_v59 = vcombine.low %v3064_v61, %v3065_v63 }
 0x922   : > { %v1963_v5 = vadd.f32 %v3773_v1, %v4845_v30  ;;  %v3657_v1 = vcombine.low %v3062_v53, %v3063_v54  ;;  %v4111_v4 = vld [vmem:[%s5252_s9 + $0x308] sm:$0xff]  }
 0x92e   : > { %v2332_v11 = vpop.f32.mrb[36].mxu0  ;;  %v3793_v13 = vpop.f32.mrb[32].mxu1 }
 0x92f   : > { %v2333_v15 = vadd.f32 %v2332_v11, %v2251_v8  ;;  %v2334_v19 = vpop.f32.mrb[37].mxu0  ;;  %v3794_v21 = vpop.f32.mrb[33].mxu1  ;;  %v4113_v8 = vld [vmem:[%s5252_s9 + $0x310] sm:$0xff]   ;;  %v4115_v11 = vld [vmem:[%s5252_s9 + $0x318] sm:$0xff]  }
 0x930   : > { %v2335_v22 = vadd.f32 %v2334_v19, %v2255_v12  ;;  %v3795_v23 = vadd.f32 %v3794_v21, %v3793_v13  ;;  %v2336_v24 = vpop.f32.mrb[38].mxu0  ;;  %v3796_v25 = vpop.f32.mrb[34].mxu1  ;;  %v4114_v12 = vld [vmem:[%s5252_s9 + $0x358] sm:$0xff]   ;;  %v4117_v13 = vld [vmem:[%s5252_s9 + $0x3c0] sm:$0xff]   ;;  %v4121_v21 = vld [vmem:[%s5252_s9 + $0x3c8] sm:$0xff]  }
 0x931   : > { %v2339_v26 = vmax.f32 %v2333_v15, 0.0  ;;  %v2337_v17 = vpop.f32.mrb[39].mxu0  ;;  %v3797_v30 = vpop.f32.mrb[35].mxu1  ;;  %v4119_v15 = vld [vmem:[%s5252_s9 + $0x380] sm:$0xff]   ;;  %v4122_v24 = vld [vmem:[%s5252_s9 + $0x328] sm:$0xff]   ;;  %v4124_v25 = vld [vmem:[%s5252_s9 + $0x370] sm:$0xff]  }
 0x932   : > { %v2340_v18 = vmax.f32 %v2335_v22, 0.0  ;;  %v5024_v20 = vadd.f32 %v3795_v23, %v1963_v5  ;;  %v3066_v5 = vld [vmem:[%s5250_s7 + $0x1b8] sm:$0xff]  ;;  %v4118_v19 = vld [vmem:[%s5252_s9 + $0x320] sm:$0xff]   ;;  %v4120_v22 = vld [vmem:[%s5252_s9 + $0x368] sm:$0xff]  }
 0x933   : > { %v2341_v9 = vpack.c.bf16 %v2339_v26, %v2339_v26  ;;  %v3661_v60 = vcombine.low %v3066_v5, %v3067_v7  ;;  %v4123_v23 = vld [vmem:[%s5252_s9 + $0x388] sm:$0xff]   ;;  %v4125_v26 = vld [vmem:[%s5252_s9 + $0x3d0] sm:$0xff]  }
 0x934   : > { %v2342_v29 = vpack.c.bf16 %v2340_v18, %v2340_v18  ;;  %v4126_v17 = vld [vmem:[%s5252_s9 + $0x330] sm:$0xff]   ;;  %v4128_v18 = vld [vmem:[%s5252_s9 + $0x378] sm:$0xff]  }
 0x935   : > { %v4127_v30 = vld [vmem:[%s5252_s9 + $0x390] sm:$0xff]  }
 0x936   : > { %2503 = vmatprep.mubr.bf16.mxu0 %v2342_v29  ;;  %v4131_v29 = vld [vmem:[%s5252_s9 + $0x398] sm:$0xff]  }
 0x937   : > { %2504 = vmatmul.mubr.bf16.vlgmr.msra.gmra.mrb[40].mxu0 %v2341_v9  ;;  %v4132_v9 = vld [vmem:[%s5252_s9 + $0x3e0] sm:$0xff]  }
 0x938   : > { %2847 = vmatpush1.bf16.msra.mxu0 %v3630_v51  ;;  %2878 = vmatprep.mubr.bf16.mxu0 %v4224_v2  ;;  %v4108_v51 = vld [vmem:[%s5252_s9 + $0x340] sm:$0xff]  }
 0x939   : > { %2848 = vmatprep.subr.bf16.mxu0 %v3633_v31  ;;  %v4133_v31 = vld [vmem:[%s5252_s9 + $0x3a0] sm:$0xff]  }
 0x93c   : > { %2849 = vmatpush1.bf16.msra.mxu0 %v3632_v34  ;;  %v4136_v34 = vld [vmem:[%s5252_s9 + $0x3f0] sm:$0xff]  }
 0x93d   : > { %2850 = vmatprep.subr.bf16.mxu0 %v3635_v36  ;;  %v4138_v36 = vld [vmem:[%s5252_s9 + $0x3f8] sm:$0xff]  }
 0x93e   : > { %v2606_v43 = vpop.f32.mrb[36].mxu1 }
 0x93f   : > { %v2607_v44 = vadd.f32 %v2606_v43, %v2525_v39  ;;  %v2608_v45 = vpop.f32.mrb[37].mxu1 }
 0x940   : > { %v2609_v46 = vadd.f32 %v2608_v45, %v2529_v41  ;;  %2851 = vmatpush1.bf16.msra.mxu0 %v3634_v40  ;;  %v2610_v47 = vpop.f32.mrb[38].mxu1 }
 0x941   : > { %v2613_v49 = vmax.f32 %v2607_v44, 0.0  ;;  %v2611_v50 = vpop.f32.mrb[39].mxu1  ;;  %2852 = vmatprep.subr.bf16.mxu0 %v3637_v42  ;;  %v2794_v44 = vld [vmem:[%s5251_s8 + $0xc] sm:$0x3] }
 0x942   : > { %v2614_v52 = vmax.f32 %v2609_v46, 0.0  ;;  %v2799_v45 = vrot.slane %v2794_v44, %v4394_v14  ;;  %v2803_v46 = vrot.slane %v2794_v44, %v4400_v16 }
 0x943   : > { %v2615_v56 = vpack.c.bf16 %v2613_v49, %v2613_v49 }
 0x944   : > { %v2616_v55 = vpack.c.bf16 %v2614_v52, %v2614_v52  ;;  %2853 = vmatpush1.bf16.msra.mxu0 %v3636_v48 }
 0x945   : > { %3843 = vmatprep.subr.bf16.mxu0 %v4108_v51 }
 0x946   : > { %2777 = vmatprep.mubr.bf16.mxu1 %v2616_v55 }
 0x947   : > { %3638 = vmatmul.mubr.msk.bf16.vlgmr.msra.gmra.mrb[44].mxu0 %vm499_vm0, %v4575_v10  ;;  %2778 = vmatmul.mubr.bf16.vlgmr.msra.gmra.mrb[40].mxu1 %v2615_v56 }
 0x948   : > { %3121 = vmatpush1.bf16.msra.mxu1 %v3655_v62  ;;  %3152 = vmatprep.mubr.bf16.mxu1 %v4224_v2  ;;  %v3662_v2 = vcombine.high %v3066_v5, %v3067_v7  ;;  %v4112_v62 = vld [vmem:[%s5252_s9 + $0x350] sm:$0xff]  }
 0x949   : > { %3122 = vmatprep.subr.bf16.mxu1 %v3658_v57  ;;  %3844 = vmatpush3.bf16.msra.mxu0 %v4109_v58 }
 0x94a   : > { %3845 = vmatprep.subr.bf16.mxu0 %v4110_v0 }
 0x94c   : > { %3123 = vmatpush1.bf16.msra.mxu1 %v3657_v1  ;;  %v3068_v1 = vld [vmem:[%s5251_s8 + $0xe] sm:$0x3] }
 0x94d   : > { %3124 = vmatprep.subr.bf16.mxu1 %v3660_v3  ;;  %3846 = vmatpush3.bf16.msra.mxu0 %v4111_v4  ;;  %v3073_v3 = vrot.slane %v3068_v1, %v4394_v14  ;;  %v3077_v4 = vrot.slane %v3068_v1, %v4400_v16 }
 0x94e   : > { %3847 = vmatprep.subr.bf16.mxu0 %v4112_v62 }
 0x950   : > { %3125 = vmatpush1.bf16.msra.mxu1 %v3659_v59 }
 0x951   : > { %3126 = vmatprep.subr.bf16.mxu1 %v3662_v2  ;;  %3848 = vmatpush3.bf16.msra.mxu0 %v4113_v8 }
 0x952   : > { %3849 = vmatprep.subr.bf16.mxu0 %v4114_v12 }
 0x954   : > { %3127 = vmatpush1.bf16.msra.mxu1 %v3661_v60 }
 0x955   : > { %3850 = vmatpush3.bf16.msra.mxu0 %v4115_v11  ;;  %3865 = vmatprep.subr.bf16.mxu1 %v4117_v13 }
 0x957   : > { %3663 = vmatmul.mubr.msk.bf16.vlgmr.msra.gmra.mrb[44].mxu1 %vm499_vm0, %v4575_v10  ;;  %v4116_v10 = vld [vmem:[%s5252_s9 + $0x360] sm:$0xff]  }
 0x958   : > { %3851 = vmatprep.subr.bf16.mxu0 %v4116_v10  ;;  %3866 = vmatpush3.bf16.msra.mxu1 %v4119_v15 }
 0x959   : > { %3867 = vmatprep.subr.bf16.mxu1 %v4121_v21  ;;  %3852 = vmatpush3.bf16.msra.mxu0 %v4118_v19 }
 0x95a   : > { %3853 = vmatprep.subr.bf16.mxu0 %v4120_v22 }
 0x95c   : > { %3868 = vmatpush3.bf16.msra.mxu1 %v4123_v23 }
 0x95d   : > { %3854 = vmatpush3.bf16.msra.mxu0 %v4122_v24  ;;  %3869 = vmatprep.subr.bf16.mxu1 %v4125_v26 }
 0x95e   : > { %3855 = vmatprep.subr.bf16.mxu0 %v4124_v25 }
 0x960   : > { %3870 = vmatpush3.bf16.msra.mxu1 %v4127_v30 }
 0x961   : > { %3856 = vmatpush3.bf16.msra.mxu0 %v4126_v17  ;;  %3871 = vmatprep.subr.bf16.mxu1 %v4129_v27  ;;  %v3680_v17 = vld [vmem:[%s5253_s10] ss:$0 sm:$0xff] }
 0x962   : > { %3857 = vmatprep.subr.bf16.mxu0 %v4128_v18 }
 0x964   : > { %3872 = vmatpush3.bf16.msra.mxu1 %v4131_v29 }
 0x965   : > { %3858 = vmatpush3.bf16.msra.mxu0 %v4130_v28  ;;  %3873 = vmatprep.subr.bf16.mxu1 %v4132_v9 }
 0x968   : > { %3874 = vmatpush3.bf16.msra.mxu1 %v4133_v31 }
 0x969   : > { %3875 = vmatprep.subr.bf16.mxu1 %v4134_v32 }
 0x96c   : > { %3876 = vmatpush3.bf16.msra.mxu1 %v4135_v33 }
 0x96d   : > { %3877 = vmatprep.subr.bf16.mxu1 %v4136_v34 }
 0x970   : > { %3878 = vmatpush3.bf16.msra.mxu1 %v4137_v35 }
 0x971   : > { %3879 = vmatprep.subr.bf16.mxu1 %v4138_v36 }
 0x974   : > { %3880 = vmatpush3.bf16.msra.mxu1 %v4139_v37 }
 0xa0a   : > { %v3815_v38 = vpop.f32.mrb[40].mxu0 }
 0xa0b   : > { %v3816_v39 = vpop.f32.mrb[41].mxu0 }
 0xa0c   : > { %v3817_v40 = vadd.f32 %v3816_v39, %v3815_v38  ;;  %v3818_v41 = vpop.f32.mrb[42].mxu0  ;;  %v3682_v39 = vld [vmem:[%s5255_s12] ss:$0 sm:$0xff] }
 0xa0d   : > { %v3819_v42 = vpop.f32.mrb[43].mxu0 }
 0xa0e   : > { %v2511_v43 = vadd.f32 %v3817_v40, %v5024_v20 }
 0xa1a   : > { %v2880_v47 = vpop.f32.mrb[44].mxu0  ;;  %v3837_v48 = vpop.f32.mrb[40].mxu1 }
 0xa1b   : > { %v2881_v49 = vadd.f32 %v2880_v47, %v2799_v45  ;;  %v2882_v50 = vpop.f32.mrb[45].mxu0  ;;  %v3838_v51 = vpop.f32.mrb[41].mxu1 }
 0xa1c   : > { %v2883_v52 = vadd.f32 %v2882_v50, %v2803_v46  ;;  %v3839_v53 = vadd.f32 %v3838_v51, %v3837_v48  ;;  %v2884_v54 = vpop.f32.mrb[46].mxu0  ;;  %v3840_v55 = vpop.f32.mrb[42].mxu1 }
 0xa1d   : > { %v2887_v56 = vmax.f32 %v2881_v49, 0.0  ;;  %v2885_v57 = vpop.f32.mrb[47].mxu0  ;;  %v3841_v20 = vpop.f32.mrb[43].mxu1 }
 0xa1e   : > { %v2888_v58 = vmax.f32 %v2883_v52, 0.0  ;;  %v2785_v61 = vadd.f32 %v3839_v53, %v2511_v43 }
 0xa1f   : > { %v2889_v0 = vpack.c.bf16 %v2887_v56, %v2887_v56 }
 0xa20   : > { %v2890_v63 = vpack.c.bf16 %v2888_v58, %v2888_v58 }
 0xa22   : > { %3051 = vmatprep.mubr.bf16.mxu0 %v2890_v63 }
 0xa23   : > { %3052 = vmatmul.mubr.bf16.vlgmr.msra.gmra.mrb[48].mxu0 %v2889_v0 }
 0xa2a   : > { %v3154_v5 = vpop.f32.mrb[44].mxu1 }
 0xa2b   : > { %v3155_v7 = vadd.f32 %v3154_v5, %v3073_v3  ;;  %v3156_v59 = vpop.f32.mrb[45].mxu1 }
 0xa2c   : > { %v3157_v2 = vadd.f32 %v3156_v59, %v3077_v4  ;;  %v3158_v60 = vpop.f32.mrb[46].mxu1 }
 0xa2d   : > { %v3161_v62 = vmax.f32 %v3155_v7, 0.0  ;;  %v3159_v8 = vpop.f32.mrb[47].mxu1 }
 0xa2e   : > { %v3162_v12 = vmax.f32 %v3157_v2, 0.0 }
 0xa2f   : > { %v3163_v10 = vpack.c.bf16 %v3161_v62, %v3161_v62 }
 0xa30   : > { %v3164_v11 = vpack.c.bf16 %v3162_v12, %v3162_v12 }
 0xa32   : > { %3325 = vmatprep.mubr.bf16.mxu1 %v3164_v11 }
 0xa33   : > { %3326 = vmatmul.mubr.bf16.vlgmr.msra.gmra.mrb[48].mxu1 %v3163_v10 }
 0xaf6   : > { %v3859_v13 = vpop.f32.mrb[48].mxu0 }
 0xaf7   : > { %v3860_v15 = vpop.f32.mrb[49].mxu0 }
 0xaf8   : > { %v3861_v19 = vadd.f32 %v3860_v15, %v3859_v13  ;;  %v3862_v21 = vpop.f32.mrb[50].mxu0 }
 0xaf9   : > { %v3863_v22 = vpop.f32.mrb[51].mxu0 }
 0xafa   : > { %v3059_v14 = vadd.f32 %v3861_v19, %v2785_v61 }
 0xb06   : > { %v3881_v23 = vpop.f32.mrb[48].mxu1 }
 0xb07   : > { %v3882_v16 = vpop.f32.mrb[49].mxu1 }
 0xb08   : > { %v3883_v24 = vadd.f32 %v3882_v16, %v3881_v23  ;;  %v3884_v25 = vpop.f32.mrb[50].mxu1 }
 0xb09   : > { %v3885_v26 = vpop.f32.mrb[51].mxu1 }
 0xb0a   : > { %v3333_v30 = vadd.f32 %v3883_v24, %v3059_v14 }
 0xb0c   : > { %v3341_v18 = vadd.f32 %v3680_v17, %v3333_v30 }
 0xb0e   : > { %v3342_v27 = vadd.f32 %v3341_v18, %v4565_v6  ;;  %v3681_v6 = vld [vmem:[%s5254_s11] ss:$0 sm:$0xff] }
 0xb10   : > { %v3345_v28 = vsel %vm499_vm0, %v3342_v27, 0.0 }
 0xb11   : > { %3346 = vadd.xlane.f32.xlu0 %v3345_v28 }
 0xb9e   : > { %v3347_v29 = vpop.xlane.xlu0 %3346 }
 0xb9f   : > { %v3348_v9 = vmul.f32 0.015625, %v3347_v29 }
 0xba1   : > { %v3349_v31 = vsub.f32 %v3342_v27, %v3348_v9 }
 0xba3   : > { %v3350_v32 = vmul.f32 %v3349_v31, %v3349_v31 }
 0xba5   : > { %v3351_v33 = vsel %vm499_vm0, %v3350_v32, 0.0 }
 0xba6   : > { %3352 = vadd.xlane.f32.xlu1 %v3351_v33 }
 0xc33   : > { %v3353_v34 = vpop.xlane.xlu1 %3352 }
 0xc34   : > { %v3354_v35 = vmul.f32 0.015625, %v3353_v34 }
 0xc36   : > { %v3355_v36 = vadd.f32 1e-05, %v3354_v35 }
 0xc38   : > { %4158 = vrsqrt.f32 %v3355_v36 }
 0xc42   : > { %v4159_v37 = vpop.eup %4158 }
 0xc43   : > { %v3357_v38 = vmul.f32 %v4159_v37, %v3349_v31 }
 0xc45   : > { %v3364_v40 = vmul.f32 %v3681_v6, %v3357_v38 }
 0xc47   : > { %v3371_v41 = vadd.f32 %v3682_v39, %v3364_v40 }
 0xc49   : > { %3372 = vst.msk [vmem:[%s431_s17] sm:$0xff] %vm499_vm0, %v3371_v41 }
 0xc4a   : > { %4173 = shalt.err (!%p4170_p3)
}
 0xc4b   : > { %s4174_s24 = scalar_lea.hbm %s5200_s22, 128  ;;  %s4178_s14 = scalar_lea.hbm %s5256_s13, 256 }
 0xc4c   : > { %p4175_p4 = scmp.ne.s32.totalorder %s5200_s22, %s4174_s24  ;;  %p4179_p9 = scmp.lt.u32.totalorder %s5200_s22, %s5256_s13 }
 0xc4d   : > { %p4180_p10 = scmp.lt.u32.totalorder %s4178_s14, %s4174_s24  ;;  %p4182_p12 = scmp.lt.u32.totalorder %s4174_s24, %s5200_s22 }
 0xc4e   : > { %p4176_p7 = pnand %p4175_p4, %p4343_p5 }
 0xc4f   : > { %p4181_p11 = por %p4180_p10, %p4179_p9 }
 0xc50   : > { %p4177_p8 = pneg %p4176_p7 }
 0xc51   : > { %p4183_p13 = por %p4182_p12, %p4181_p11 }
 0xc53   : > { %p4184_p0 = pnand %p4183_p13, %p4177_p8 }
 0xc55   : > { %4187 = shalt.err (!%p4184_p0)
}
 0xc56   : > { %3947 = dma.vmem_to_hbm [thread:$0]  (%p4343_p5), %s5202_s19, 128, %s5200_s22, %s3374_s23  }
 0xc57 PF: > { %s5269_s15 = sld [smem:[#allocation6_spill]]  ;;  %p3953_p1 = scmp.ge.s32.totalorder %s4222_s28, 2 }
 0xc59   : > { %p3950_p2 = pnand %p3953_p1, %p4347_p6 }
 0xc5d   : > { %s3399_s29 = sand.u32 1, %s5269_s15  }
 0xc5e   : > { %s3400_s30 = scalar_lea.sflag [#allocation4], %s3399_s29 }
 0xc5f   : > { %4205 = dma.done.wait (!%p3950_p2), %s3400_s30, 128  }
 0xc60   : > { %4207 = vsyncadd (!%p3950_p2), %s3400_s30, 4294967168  ;;  %s5271_s28 = sld [smem:[#allocation8_spill]]  ;;  %s5272_s20 = sld [smem:[#allocation7_spill]] }
 0xc61   : > { %s5273_s27 = sld [smem:[#allocation9_spill]]  ;;  %s5274_s25 = smov %s4214_s26 }
 0xc66   : > { %p23_p3 = scmp.ge.s32.totalorder %s5271_s28, 4   ;;  %s5275_s26 = smov %s5272_s20 }
 0xc68   :  { %25 = sbr.rel (!%p23_p3) target bundleno = 3 (0x3), region = 107 }
 0xc6f   :  { %3405 = vsyncpa [#allocation4], 1 }
 0xc70   :  { %3407 = vsyncpa [#allocation4 + $0x1], 1 }

</bundles_post_ra>
